<compile_context>
chip_gen: v7x
topology: tpu7x:2x2x1
jax: 0.10.0
libtpu: 0.0.40
codegen_flags: <defaults>
</compile_context>

<pallas_src>
import jax
import jax.numpy as jnp
from jax.experimental import pallas as pl
from jax.experimental.pallas import tpu as pltpu

# ----------------------------- model config ---------------------------------
B = 2            # batch
S = 8            # sequence length
H = 32           # hidden size  (BERT-base would be 768)
NH = 2           # attention heads
HD = H // NH     # head dim
FF = 4 * H       # feed-forward intermediate (= 128, one full lane width)
L = 2            # encoder layers (BERT-base would be 12)
VOCAB = 100
VOCAB_PAD = 128  # lane-padded vocab for the in-kernel one-hot gather
NTYPES = 2
NCLS = 2         # fc = Linear(hidden, 2)
NCLS_PAD = 128   # lane-dense classifier/output width (sliced in the wrapper)
BS = B * S
LN_EPS = 1e-12

# rows of the per-layer (8, FF) bias / LayerNorm vector slab
(ROW_QKV_B, ROW_ATTN_B, ROW_LN1_G, ROW_LN1_B,
 ROW_FFN_B1, ROW_FFN_B2, ROW_LN2_G, ROW_LN2_B) = range(8)

VMEM_SPEC = pl.BlockSpec(memory_space=pltpu.MemorySpace.VMEM)


# ------------------------------ helpers --------------------------------------
def _vrow(vec, r, width):
    """One (1, width) row of a packed 2-D parameter slab."""
    return vec[r:r + 1, :width]


def _layer_norm(x, gamma, beta):
    mu = jnp.mean(x, axis=-1, keepdims=True)
    xc = x - mu
    var = jnp.mean(xc * xc, axis=-1, keepdims=True)
    return xc * jax.lax.rsqrt(var + LN_EPS) * gamma + beta


def _softmax_last(x, approx):
    m = jnp.max(x, axis=-1, keepdims=True)
    e = jnp.exp(x - m)
    s = jnp.sum(e, axis=-1, keepdims=True)
    if approx:
        return e * pl.reciprocal(s, approx=True)   # EUP, frees VALU
    return e / s


# --------------------------- fused Pallas kernel ------------------------------
def bmodel_kernel(ctx_ref, typ_ref, mask_ref, word_ref, type_ref, pos_ref,
                  emb_ln_ref, qkv_w_ref, wo_w_ref, ffn_w1_ref, ffn_w2_ref,
                  vec_ref, pool_w_ref, fc_w_ref, head_b_ref, out_ref):
    # ---- in-kernel embedding lookup -----------------------------------------
    # Word lookup as a one-hot MXU matmul (exact row selection, f32 operands).
    ctx = ctx_ref[...]                                               # (B, S) i32
    iota_v = jax.lax.broadcasted_iota(jnp.int32, (B, S, VOCAB_PAD), 2)
    onehot = (ctx[:, :, None] == iota_v).astype(jnp.float32)
    onehot = onehot.reshape(BS, VOCAB_PAD)                           # (BS, 128)
    word = jnp.dot(onehot, word_ref[...],
                   preferred_element_type=jnp.float32)               # (BS, H)

    # Token-type embedding: 2-way select; position embedding: sublane tile.
    typ = typ_ref[...]                                               # (B, S) i32
    type_rows = jnp.where(typ[:, :, None] == 0,
                          type_ref[0:1, :], type_ref[1:2, :]).reshape(BS, H)
    pos = jnp.tile(pos_ref[...], (B, 1))                             # (BS, H)

    emb_ln = emb_ln_ref[...]                                         # (2, H)
    x = _layer_norm(word + type_rows + pos, emb_ln[0:1, :], emb_ln[1:2, :])

    # ---- additive attention bias, head-major batch order (h*B + b) ----------
    neg = (1.0 - mask_ref[...]) * jnp.float32(-10000.0)              # (B, S)
    attn_bias = jnp.tile(neg, (NH, 1))[:, None, :]                   # (NH*B, 1, S)

    def split_heads(t):
        """(BS, H) -> (NH*B, S, HD) bf16, head-major batch, no 4-D transpose."""
        parts = [t[:, h * HD:(h + 1) * HD].reshape(B, S, HD) for h in range(NH)]
        return jnp.concatenate(parts, axis=0).astype(jnp.bfloat16)

    for l in range(L):                                               # static unroll
        # Per-layer parameter reads through the Ref (short live ranges).
        qkv_w = qkv_w_ref[l]            # (H, 3H)  bf16, Q cols pre-scaled
        wo_w = wo_w_ref[l]              # (H, H)   bf16
        w1 = ffn_w1_ref[l]              # (H, FF)  bf16
        w2 = ffn_w2_ref[l]              # (FF, H)  bf16
        vec = vec_ref[l]                # (8, FF)  f32 biases / LN params

        # ---- self-attention: one fused QKV projection ------------------------
        qkv = jnp.dot(x.astype(jnp.bfloat16), qkv_w,
                      preferred_element_type=jnp.float32)            # (BS, 3H)
        qkv = qkv + _vrow(vec, ROW_QKV_B, 3 * H)

        qh = split_heads(qkv[:, 0:H])                                # (NH*B,S,HD)
        kh = split_heads(qkv[:, H:2 * H])
        vh = split_heads(qkv[:, 2 * H:3 * H])

        s = jnp.einsum('bqd,bkd->bqk', qh, kh,
                       preferred_element_type=jnp.float32) + attn_bias
        p = _softmax_last(s, approx=True)                            # (NH*B,S,S)
        ctxh = jnp.einsum('bqk,bkd->bqd', p.astype(jnp.bfloat16), vh,
                          preferred_element_type=jnp.float32)        # (NH*B,S,HD)

        # back to (BS, H): heads laid out along lanes, then a single Wo matmul
        ctx_flat = jnp.concatenate(
            [ctxh[h * B:(h + 1) * B].reshape(BS, HD) for h in range(NH)],
            axis=-1)                                                 # (BS, H)
        attn = jnp.dot(ctx_flat.astype(jnp.bfloat16), wo_w,
                       preferred_element_type=jnp.float32)
        attn = attn + _vrow(vec, ROW_ATTN_B, H)
        x1 = _layer_norm(x + attn,
                         _vrow(vec, ROW_LN1_G, H), _vrow(vec, ROW_LN1_B, H))

        # ---- feed-forward -----------------------------------------------------
        inter = jnp.dot(x1.astype(jnp.bfloat16), w1,
                        preferred_element_type=jnp.float32)          # (BS, FF)
        inter = inter + _vrow(vec, ROW_FFN_B1, FF)
        # TODO(synk): HF/PyTorch BERT uses exact erf GELU; tanh approximation here.
        inter = jax.nn.gelu(inter, approximate=True)
        ffn = jnp.dot(inter.astype(jnp.bfloat16), w2,
                      preferred_element_type=jnp.float32)            # (BS, H)
        ffn = ffn + _vrow(vec, ROW_FFN_B2, H)
        x = _layer_norm(x1 + ffn,
                        _vrow(vec, ROW_LN2_G, H), _vrow(vec, ROW_LN2_B, H))

    # ---- pooler + classifier head (fused into the same kernel) ---------------
    head_b = head_b_ref[...]                                         # (2, 128)
    cls = x.reshape(B, S, H)[:, 0, :]                                # (B, H)
    pooled = jnp.tanh(jnp.dot(cls.astype(jnp.bfloat16), pool_w_ref[...],
                              preferred_element_type=jnp.float32)
                      + head_b[0:1, :H])
    # TODO(synk): F.dropout(p=0.5, training=self.training) -> identity in eval.
    logits = jnp.dot(pooled.astype(jnp.bfloat16), fc_w_ref[...],
                     preferred_element_type=jnp.float32) + head_b[1:2, :]
    col = jax.lax.broadcasted_iota(jnp.int32, (B, NCLS_PAD), 1)
    logits = jnp.where(col < NCLS, logits, jnp.float32(-1e30))       # mask pad cols
    out_ref[...] = _softmax_last(logits, approx=False)               # exact probs


# ------------------------------ wrapper ---------------------------------------
def bmodel_pallas_call(context, types, mask_f, params):
    inputs = (context, types, mask_f,
              params["word_emb"], params["type_emb"], params["pos_emb"],
              params["emb_ln"], params["qkv_w"], params["wo_w"],
              params["ffn_w1"], params["ffn_w2"], params["vec"],
              params["pool_w"], params["fc_w"], params["head_b"])
    probs_padded = pl.pallas_call(
        bmodel_kernel,
        out_shape=jax.ShapeDtypeStruct((B, NCLS_PAD), jnp.float32),
        in_specs=[VMEM_SPEC] * len(inputs),
        out_specs=VMEM_SPEC,
    )(*inputs)
    return probs_padded[:, :NCLS]                                    # (B, 2)


# --------------------------- parameter setup ----------------------------------
def init_params(key):
    def nrm(k, shape, scale=0.02):
        return (scale * jax.random.normal(k, shape)).astype(jnp.float32)

    keys = iter(jax.random.split(key, 8 + 6 * L))
    q_scale = 1.0 / float(HD) ** 0.5

    word = jnp.zeros((VOCAB_PAD, H), jnp.float32).at[:VOCAB].set(
        nrm(next(keys), (VOCAB, H)))
    fc = jnp.zeros((H, NCLS_PAD), jnp.float32).at[:, :NCLS].set(
        nrm(next(keys), (H, NCLS)))

    params = {
        "word_emb": word,                                   # (128, H) f32
        "type_emb": nrm(next(keys), (NTYPES, H)),           # (2, H)   f32
        "pos_emb": nrm(next(keys), (S, H)),                 # (S, H)   f32
        # rows: [gamma, beta] of the embedding LayerNorm
        "emb_ln": jnp.stack([jnp.ones((H,)), jnp.zeros((H,))]).astype(jnp.float32),
        "pool_w": nrm(next(keys), (H, H)).astype(jnp.bfloat16),
        "fc_w": fc.astype(jnp.bfloat16),                    # (H, 128) bf16, zero-pad
        # rows: [pool_b (first H), fc_b (first NCLS)], lane-padded to 128
        "head_b": jnp.zeros((2, NCLS_PAD), jnp.float32),
    }

    qkv_w, wo_w, w1s, w2s, vecs = [], [], [], [], []
    for _ in range(L):
        # fold the 1/sqrt(HD) attention scale into the Q projection weights
        wq = nrm(next(keys), (H, H)) * q_scale
        wk = nrm(next(keys), (H, H))
        wv = nrm(next(keys), (H, H))
        wo = nrm(next(keys), (H, H))
        qkv_w.append(jnp.concatenate([wq, wk, wv], axis=1))          # (H, 3H)
        wo_w.append(wo)                                              # (H, H)
        w1s.append(nrm(next(keys), (H, FF)))
        w2s.append(nrm(next(keys), (FF, H)))
        vec = jnp.zeros((8, FF), jnp.float32)                        # biases = 0
        # NOTE: vec[ROW_QKV_B, :H] (the Q bias) would also need * q_scale if it
        # were nonzero, to keep the folded scaling exact.
        vec = vec.at[ROW_LN1_G, :H].set(1.0)                         # LN gammas = 1
        vec = vec.at[ROW_LN2_G, :H].set(1.0)
        vecs.append(vec)

    params["qkv_w"] = jnp.stack(qkv_w).astype(jnp.bfloat16)   # (L, H, 3H)
    params["wo_w"] = jnp.stack(wo_w).astype(jnp.bfloat16)     # (L, H, H)
    params["ffn_w1"] = jnp.stack(w1s).astype(jnp.bfloat16)    # (L, H, FF)
    params["ffn_w2"] = jnp.stack(w2s).astype(jnp.bfloat16)    # (L, FF, H)
    params["vec"] = jnp.stack(vecs)                           # (L, 8, FF) f32
    return params


# ------------------------------ forward ---------------------------------------
@jax.jit
def bmodel_forward(context, types, mask, params):
    # Everything — embedding gathers, embed LayerNorm, both encoder layers,
    # pooler, classifier, softmax — runs inside ONE Pallas kernel.
    return bmodel_pallas_call(context, types, mask.astype(jnp.float32), params)


# -------------------------------- main ----------------------------------------
if __name__ == "__main__":
    root = jax.random.PRNGKey(0)
    k_param, k_ctx = jax.random.split(root)

    params = init_params(k_param)

    context = jax.random.randint(k_ctx, (B, S), 0, VOCAB, dtype=jnp.int32)
    types = jnp.zeros((B, S), dtype=jnp.int32).at[:, S // 2:].set(1)
    mask = jnp.ones((B, S), dtype=jnp.int32).at[1, S - 2:].set(0)   # pad row 1

    out = jax.block_until_ready(bmodel_forward(context, types, mask, params))

    assert out.shape == (B, NCLS)
    assert bool(jnp.all(jnp.isfinite(out)))
    # final softmax rows sum to 1 (exact reciprocal used for the output softmax)
    assert bool(jnp.all(jnp.abs(jnp.sum(out, axis=1) - 1.0) < 1e-5))
    print("KERNEL_OK")
</pallas_src>

<mosaic_0001>
module attributes {stable_mosaic.version = 11 : i64} {
  func.func @bmodel_kernel(%arg0: memref<2x8xi32, #tpu.memory_space<vmem>>, %arg1: memref<2x8xi32, #tpu.memory_space<vmem>>, %arg2: memref<2x8xf32, #tpu.memory_space<vmem>>, %arg3: memref<128x32xf32, #tpu.memory_space<vmem>>, %arg4: memref<2x32xf32, #tpu.memory_space<vmem>>, %arg5: memref<8x32xf32, #tpu.memory_space<vmem>>, %arg6: memref<2x32xf32, #tpu.memory_space<vmem>>, %arg7: memref<2x32x96xbf16, #tpu.memory_space<vmem>>, %arg8: memref<2x32x32xbf16, #tpu.memory_space<vmem>>, %arg9: memref<2x32x128xbf16, #tpu.memory_space<vmem>>, %arg10: memref<2x128x32xbf16, #tpu.memory_space<vmem>>, %arg11: memref<2x8x128xf32, #tpu.memory_space<vmem>>, %arg12: memref<32x32xbf16, #tpu.memory_space<vmem>>, %arg13: memref<32x128xbf16, #tpu.memory_space<vmem>>, %arg14: memref<2x128xf32, #tpu.memory_space<vmem>>, %arg15: memref<2x128xf32, #tpu.memory_space<vmem>>) attributes {dimension_semantics = [], scalar_prefetch = 0 : i64, scratch_operands = 0 : i64, tpu.core_type = #tpu.core_type<tc>} {
    %c0 = arith.constant 0 : index
    %c0_0 = arith.constant 0 : index
    %0 = vector.load %arg0[%c0, %c0_0] : memref<2x8xi32, #tpu.memory_space<vmem>>, vector<2x8xi32>
    %1 = tpu.iota {dimensions = array<i32: 2>} : vector<2x8x128xi32>
    %2 = vector.shape_cast %0 : vector<2x8xi32> to vector<2x8x1xi32>
    %3 = vector.broadcast %2 : vector<2x8x1xi32> to vector<2x8x128xi32>
    %4 = arith.cmpi eq, %3, %1 : vector<2x8x128xi32>
    %5 = arith.extui %4 : vector<2x8x128xi1> to vector<2x8x128xi32>
    %6 = arith.sitofp %5 : vector<2x8x128xi32> to vector<2x8x128xf32>
    %7 = vector.shape_cast %6 : vector<2x8x128xf32> to vector<16x128xf32>
    %c0_1 = arith.constant 0 : index
    %c0_2 = arith.constant 0 : index
    %8 = vector.load %arg3[%c0_1, %c0_2] : memref<128x32xf32, #tpu.memory_space<vmem>>, vector<128x32xf32>
    %cst = arith.constant dense<0.000000e+00> : vector<16x32xf32>
    %9 = tpu.matmul %7, %8, %cst {dimension_numbers = #tpu.dot_dimension_numbers<[1], [0], [0], [1], [0, 0, 1, 1], [], []>} : vector<16x128xf32>, vector<128x32xf32>, vector<16x32xf32> -> vector<16x32xf32>
    %c0_3 = arith.constant 0 : index
    %c0_4 = arith.constant 0 : index
    %10 = vector.load %arg1[%c0_3, %c0_4] : memref<2x8xi32, #tpu.memory_space<vmem>>, vector<2x8xi32>
    %11 = vector.shape_cast %10 : vector<2x8xi32> to vector<2x8x1xi32>
    %c0_i32 = arith.constant 0 : i32
    %12 = vector.broadcast %c0_i32 : i32 to vector<2x8x1xi32>
    %13 = arith.cmpi eq, %11, %12 : vector<2x8x1xi32>
    %c0_5 = arith.constant 0 : index
    %c0_6 = arith.constant 0 : index
    %14 = vector.load %arg4[%c0_5, %c0_6] : memref<2x32xf32, #tpu.memory_space<vmem>>, vector<1x32xf32>
    %c1 = arith.constant 1 : index
    %c0_7 = arith.constant 0 : index
    %15 = vector.load %arg4[%c1, %c0_7] : memref<2x32xf32, #tpu.memory_space<vmem>>, vector<1x32xf32>
    %16 = vector.shape_cast %13 : vector<2x8x1xi1> to vector<2x8x1xi1>
    %17 = vector.broadcast %16 : vector<2x8x1xi1> to vector<2x8x32xi1>
    %18 = vector.shape_cast %14 : vector<1x32xf32> to vector<1x1x32xf32>
    %19 = vector.broadcast %18 : vector<1x1x32xf32> to vector<2x8x32xf32>
    %20 = vector.shape_cast %15 : vector<1x32xf32> to vector<1x1x32xf32>
    %21 = vector.broadcast %20 : vector<1x1x32xf32> to vector<2x8x32xf32>
    %22 = arith.select %17, %19, %21 : vector<2x8x32xi1>, vector<2x8x32xf32>
    %23 = vector.shape_cast %22 : vector<2x8x32xf32> to vector<16x32xf32>
    %c0_8 = arith.constant 0 : index
    %c0_9 = arith.constant 0 : index
    %24 = vector.load %arg5[%c0_8, %c0_9] : memref<8x32xf32, #tpu.memory_space<vmem>>, vector<8x32xf32>
    %25 = tpu.concatenate %24, %24 in 0 : vector<8x32xf32>, vector<8x32xf32> -> vector<16x32xf32>
    %c0_10 = arith.constant 0 : index
    %c0_11 = arith.constant 0 : index
    %26 = vector.load %arg6[%c0_10, %c0_11] : memref<2x32xf32, #tpu.memory_space<vmem>>, vector<2x32xf32>
    %27 = arith.addf %9, %23 : vector<16x32xf32>
    %28 = arith.addf %27, %25 : vector<16x32xf32>
    %29 = vector.extract_strided_slice %26 {offsets = [0, 0], sizes = [1, 32], strides = [1, 1]} : vector<2x32xf32> to vector<1x32xf32>
    %30 = vector.extract_strided_slice %26 {offsets = [1, 0], sizes = [1, 32], strides = [1, 1]} : vector<2x32xf32> to vector<1x32xf32>
    %cst_12 = arith.constant dense<0.000000e+00> : vector<16xf32>
    %31 = vector.multi_reduction <add>, %28, %cst_12 [1] : vector<16x32xf32> to vector<16xf32>
    %32 = vector.shape_cast %31 : vector<16xf32> to vector<16x1xf32>
    %cst_13 = arith.constant 3.200000e+01 : f32
    %33 = vector.broadcast %cst_13 : f32 to vector<16x1xf32>
    %34 = arith.divf %32, %33 : vector<16x1xf32>
    %35 = vector.broadcast %34 : vector<16x1xf32> to vector<16x32xf32>
    %36 = arith.subf %28, %35 : vector<16x32xf32>
    %37 = arith.mulf %36, %36 : vector<16x32xf32>
    %cst_14 = arith.constant dense<0.000000e+00> : vector<16xf32>
    %38 = vector.multi_reduction <add>, %37, %cst_14 [1] : vector<16x32xf32> to vector<16xf32>
    %39 = vector.shape_cast %38 : vector<16xf32> to vector<16x1xf32>
    %cst_15 = arith.constant 3.200000e+01 : f32
    %40 = vector.broadcast %cst_15 : f32 to vector<16x1xf32>
    %41 = arith.divf %39, %40 : vector<16x1xf32>
    %cst_16 = arith.constant 9.99999996E-13 : f32
    %42 = vector.broadcast %cst_16 : f32 to vector<16x1xf32>
    %43 = arith.addf %41, %42 : vector<16x1xf32>
    %44 = math.rsqrt %43 : vector<16x1xf32>
    %45 = vector.broadcast %44 : vector<16x1xf32> to vector<16x32xf32>
    %46 = arith.mulf %36, %45 : vector<16x32xf32>
    %47 = vector.broadcast %29 : vector<1x32xf32> to vector<16x32xf32>
    %48 = arith.mulf %46, %47 : vector<16x32xf32>
    %49 = vector.broadcast %30 : vector<1x32xf32> to vector<16x32xf32>
    %50 = arith.addf %48, %49 : vector<16x32xf32>
    %c0_17 = arith.constant 0 : index
    %c0_18 = arith.constant 0 : index
    %51 = vector.load %arg2[%c0_17, %c0_18] : memref<2x8xf32, #tpu.memory_space<vmem>>, vector<2x8xf32>
    %cst_19 = arith.constant 1.000000e+00 : f32
    %52 = vector.broadcast %cst_19 : f32 to vector<2x8xf32>
    %53 = arith.subf %52, %51 : vector<2x8xf32>
    %cst_20 = arith.constant -1.000000e+04 : f32
    %54 = vector.broadcast %cst_20 : f32 to vector<2x8xf32>
    %55 = arith.mulf %53, %54 : vector<2x8xf32>
    %56 = tpu.concatenate %55, %55 in 0 : vector<2x8xf32>, vector<2x8xf32> -> vector<4x8xf32>
    %57 = vector.shape_cast %56 : vector<4x8xf32> to vector<4x1x8xf32>
    %c0_21 = arith.constant 0 : index
    %c0_22 = arith.constant 0 : index
    %c0_23 = arith.constant 0 : index
    %58 = vector.load %arg7[%c0_21, %c0_22, %c0_23] : memref<2x32x96xbf16, #tpu.memory_space<vmem>>, vector<1x32x96xbf16>
    %59 = vector.shape_cast %58 : vector<1x32x96xbf16> to vector<32x96xbf16>
    %c0_24 = arith.constant 0 : index
    %c0_25 = arith.constant 0 : index
    %c0_26 = arith.constant 0 : index
    %60 = vector.load %arg8[%c0_24, %c0_25, %c0_26] : memref<2x32x32xbf16, #tpu.memory_space<vmem>>, vector<1x32x32xbf16>
    %61 = vector.shape_cast %60 : vector<1x32x32xbf16> to vector<32x32xbf16>
    %c0_27 = arith.constant 0 : index
    %c0_28 = arith.constant 0 : index
    %c0_29 = arith.constant 0 : index
    %62 = vector.load %arg9[%c0_27, %c0_28, %c0_29] : memref<2x32x128xbf16, #tpu.memory_space<vmem>>, vector<1x32x128xbf16>
    %63 = vector.shape_cast %62 : vector<1x32x128xbf16> to vector<32x128xbf16>
    %c0_30 = arith.constant 0 : index
    %c0_31 = arith.constant 0 : index
    %c0_32 = arith.constant 0 : index
    %64 = vector.load %arg10[%c0_30, %c0_31, %c0_32] : memref<2x128x32xbf16, #tpu.memory_space<vmem>>, vector<1x128x32xbf16>
    %65 = vector.shape_cast %64 : vector<1x128x32xbf16> to vector<128x32xbf16>
    %c0_33 = arith.constant 0 : index
    %c0_34 = arith.constant 0 : index
    %c0_35 = arith.constant 0 : index
    %66 = vector.load %arg11[%c0_33, %c0_34, %c0_35] : memref<2x8x128xf32, #tpu.memory_space<vmem>>, vector<1x8x128xf32>
    %67 = vector.shape_cast %66 : vector<1x8x128xf32> to vector<8x128xf32>
    %68 = arith.truncf %50 : vector<16x32xf32> to vector<16x32xbf16>
    %cst_36 = arith.constant dense<0.000000e+00> : vector<16x96xf32>
    %69 = tpu.matmul %68, %59, %cst_36 {dimension_numbers = #tpu.dot_dimension_numbers<[1], [0], [0], [1], [0, 0, 1, 1], [], []>} : vector<16x32xbf16>, vector<32x96xbf16>, vector<16x96xf32> -> vector<16x96xf32>
    %70 = vector.extract_strided_slice %67 {offsets = [0, 0], sizes = [1, 96], strides = [1, 1]} : vector<8x128xf32> to vector<1x96xf32>
    %71 = vector.broadcast %70 : vector<1x96xf32> to vector<16x96xf32>
    %72 = arith.addf %69, %71 : vector<16x96xf32>
    %73 = vector.extract_strided_slice %72 {offsets = [0, 0], sizes = [16, 32], strides = [1, 1]} : vector<16x96xf32> to vector<16x32xf32>
    %74 = vector.extract_strided_slice %73 {offsets = [0, 0], sizes = [16, 16], strides = [1, 1]} : vector<16x32xf32> to vector<16x16xf32>
    %75 = vector.shape_cast %74 : vector<16x16xf32> to vector<2x8x16xf32>
    %76 = vector.extract_strided_slice %73 {offsets = [0, 16], sizes = [16, 16], strides = [1, 1]} : vector<16x32xf32> to vector<16x16xf32>
    %77 = vector.shape_cast %76 : vector<16x16xf32> to vector<2x8x16xf32>
    %78 = tpu.concatenate %75, %77 in 0 : vector<2x8x16xf32>, vector<2x8x16xf32> -> vector<4x8x16xf32>
    %79 = arith.truncf %78 : vector<4x8x16xf32> to vector<4x8x16xbf16>
    %80 = vector.extract_strided_slice %72 {offsets = [0, 32], sizes = [16, 32], strides = [1, 1]} : vector<16x96xf32> to vector<16x32xf32>
    %81 = vector.extract_strided_slice %80 {offsets = [0, 0], sizes = [16, 16], strides = [1, 1]} : vector<16x32xf32> to vector<16x16xf32>
    %82 = vector.shape_cast %81 : vector<16x16xf32> to vector<2x8x16xf32>
    %83 = vector.extract_strided_slice %80 {offsets = [0, 16], sizes = [16, 16], strides = [1, 1]} : vector<16x32xf32> to vector<16x16xf32>
    %84 = vector.shape_cast %83 : vector<16x16xf32> to vector<2x8x16xf32>
    %85 = tpu.concatenate %82, %84 in 0 : vector<2x8x16xf32>, vector<2x8x16xf32> -> vector<4x8x16xf32>
    %86 = arith.truncf %85 : vector<4x8x16xf32> to vector<4x8x16xbf16>
    %87 = vector.extract_strided_slice %72 {offsets = [0, 64], sizes = [16, 32], strides = [1, 1]} : vector<16x96xf32> to vector<16x32xf32>
    %88 = vector.extract_strided_slice %87 {offsets = [0, 0], sizes = [16, 16], strides = [1, 1]} : vector<16x32xf32> to vector<16x16xf32>
    %89 = vector.shape_cast %88 : vector<16x16xf32> to vector<2x8x16xf32>
    %90 = vector.extract_strided_slice %87 {offsets = [0, 16], sizes = [16, 16], strides = [1, 1]} : vector<16x32xf32> to vector<16x16xf32>
    %91 = vector.shape_cast %90 : vector<16x16xf32> to vector<2x8x16xf32>
    %92 = tpu.concatenate %89, %91 in 0 : vector<2x8x16xf32>, vector<2x8x16xf32> -> vector<4x8x16xf32>
    %93 = arith.truncf %92 : vector<4x8x16xf32> to vector<4x8x16xbf16>
    "tpu.trace_start"() <{level = 10 : i32, message = "bqd,bkd->bqk"}> : () -> ()
    %cst_37 = arith.constant dense<0.000000e+00> : vector<4x8x8xf32>
    %94 = tpu.matmul %79, %86, %cst_37 {dimension_numbers = #tpu.dot_dimension_numbers<[2], [2], [1], [1], [0, 0, 0, 1, 1, 1], [0], [0]>} : vector<4x8x16xbf16>, vector<4x8x16xbf16>, vector<4x8x8xf32> -> vector<4x8x8xf32>
    "tpu.trace_stop"() : () -> ()
    %95 = vector.broadcast %57 : vector<4x1x8xf32> to vector<4x8x8xf32>
    %96 = arith.addf %94, %95 : vector<4x8x8xf32>
    %cst_38 = arith.constant dense<0xFF800000> : vector<4x8xf32>
    %97 = vector.multi_reduction <maximumf>, %96, %cst_38 [2] : vector<4x8x8xf32> to vector<4x8xf32>
    %98 = vector.shape_cast %97 : vector<4x8xf32> to vector<4x8x1xf32>
    %99 = vector.broadcast %98 : vector<4x8x1xf32> to vector<4x8x8xf32>
    %100 = arith.subf %96, %99 : vector<4x8x8xf32>
    %101 = math.exp %100 : vector<4x8x8xf32>
    %cst_39 = arith.constant dense<0.000000e+00> : vector<4x8xf32>
    %102 = vector.multi_reduction <add>, %101, %cst_39 [2] : vector<4x8x8xf32> to vector<4x8xf32>
    %103 = vector.shape_cast %102 : vector<4x8xf32> to vector<4x8x1xf32>
    %104 = tpu.reciprocal %103 {approx = true} : vector<4x8x1xf32> -> vector<4x8x1xf32>
    %105 = vector.broadcast %104 : vector<4x8x1xf32> to vector<4x8x8xf32>
    %106 = arith.mulf %101, %105 : vector<4x8x8xf32>
    %107 = arith.truncf %106 : vector<4x8x8xf32> to vector<4x8x8xbf16>
    "tpu.trace_start"() <{level = 10 : i32, message = "bqk,bkd->bqd"}> : () -> ()
    %cst_40 = arith.constant dense<0.000000e+00> : vector<4x8x16xf32>
    %108 = tpu.matmul %107, %93, %cst_40 {dimension_numbers = #tpu.dot_dimension_numbers<[2], [1], [1], [2], [0, 0, 0, 1, 1, 2], [0], [0]>} : vector<4x8x8xbf16>, vector<4x8x16xbf16>, vector<4x8x16xf32> -> vector<4x8x16xf32>
    "tpu.trace_stop"() : () -> ()
    %109 = vector.extract_strided_slice %108 {offsets = [0, 0, 0], sizes = [2, 8, 16], strides = [1, 1, 1]} : vector<4x8x16xf32> to vector<2x8x16xf32>
    %110 = vector.shape_cast %109 : vector<2x8x16xf32> to vector<16x16xf32>
    %111 = vector.extract_strided_slice %108 {offsets = [2, 0, 0], sizes = [2, 8, 16], strides = [1, 1, 1]} : vector<4x8x16xf32> to vector<2x8x16xf32>
    %112 = vector.shape_cast %111 : vector<2x8x16xf32> to vector<16x16xf32>
    %113 = tpu.concatenate %110, %112 in 1 : vector<16x16xf32>, vector<16x16xf32> -> vector<16x32xf32>
    %114 = arith.truncf %113 : vector<16x32xf32> to vector<16x32xbf16>
    %cst_41 = arith.constant dense<0.000000e+00> : vector<16x32xf32>
    %115 = tpu.matmul %114, %61, %cst_41 {dimension_numbers = #tpu.dot_dimension_numbers<[1], [0], [0], [1], [0, 0, 1, 1], [], []>} : vector<16x32xbf16>, vector<32x32xbf16>, vector<16x32xf32> -> vector<16x32xf32>
    %116 = vector.extract_strided_slice %67 {offsets = [1, 0], sizes = [1, 32], strides = [1, 1]} : vector<8x128xf32> to vector<1x32xf32>
    %117 = vector.broadcast %116 : vector<1x32xf32> to vector<16x32xf32>
    %118 = arith.addf %115, %117 : vector<16x32xf32>
    %119 = arith.addf %50, %118 : vector<16x32xf32>
    %120 = vector.extract_strided_slice %67 {offsets = [2, 0], sizes = [1, 32], strides = [1, 1]} : vector<8x128xf32> to vector<1x32xf32>
    %121 = vector.extract_strided_slice %67 {offsets = [3, 0], sizes = [1, 32], strides = [1, 1]} : vector<8x128xf32> to vector<1x32xf32>
    %cst_42 = arith.constant dense<0.000000e+00> : vector<16xf32>
    %122 = vector.multi_reduction <add>, %119, %cst_42 [1] : vector<16x32xf32> to vector<16xf32>
    %123 = vector.shape_cast %122 : vector<16xf32> to vector<16x1xf32>
    %cst_43 = arith.constant 3.200000e+01 : f32
    %124 = vector.broadcast %cst_43 : f32 to vector<16x1xf32>
    %125 = arith.divf %123, %124 : vector<16x1xf32>
    %126 = vector.broadcast %125 : vector<16x1xf32> to vector<16x32xf32>
    %127 = arith.subf %119, %126 : vector<16x32xf32>
    %128 = arith.mulf %127, %127 : vector<16x32xf32>
    %cst_44 = arith.constant dense<0.000000e+00> : vector<16xf32>
    %129 = vector.multi_reduction <add>, %128, %cst_44 [1] : vector<16x32xf32> to vector<16xf32>
    %130 = vector.shape_cast %129 : vector<16xf32> to vector<16x1xf32>
    %cst_45 = arith.constant 3.200000e+01 : f32
    %131 = vector.broadcast %cst_45 : f32 to vector<16x1xf32>
    %132 = arith.divf %130, %131 : vector<16x1xf32>
    %cst_46 = arith.constant 9.99999996E-13 : f32
    %133 = vector.broadcast %cst_46 : f32 to vector<16x1xf32>
    %134 = arith.addf %132, %133 : vector<16x1xf32>
    %135 = math.rsqrt %134 : vector<16x1xf32>
    %136 = vector.broadcast %135 : vector<16x1xf32> to vector<16x32xf32>
    %137 = arith.mulf %127, %136 : vector<16x32xf32>
    %138 = vector.broadcast %120 : vector<1x32xf32> to vector<16x32xf32>
    %139 = arith.mulf %137, %138 : vector<16x32xf32>
    %140 = vector.broadcast %121 : vector<1x32xf32> to vector<16x32xf32>
    %141 = arith.addf %139, %140 : vector<16x32xf32>
    %142 = arith.truncf %141 : vector<16x32xf32> to vector<16x32xbf16>
    %cst_47 = arith.constant dense<0.000000e+00> : vector<16x128xf32>
    %143 = tpu.matmul %142, %63, %cst_47 {dimension_numbers = #tpu.dot_dimension_numbers<[1], [0], [0], [1], [0, 0, 1, 1], [], []>} : vector<16x32xbf16>, vector<32x128xbf16>, vector<16x128xf32> -> vector<16x128xf32>
    %144 = vector.extract_strided_slice %67 {offsets = [4, 0], sizes = [1, 128], strides = [1, 1]} : vector<8x128xf32> to vector<1x128xf32>
    %145 = vector.broadcast %144 : vector<1x128xf32> to vector<16x128xf32>
    %146 = arith.addf %143, %145 : vector<16x128xf32>
    %147 = arith.mulf %146, %146 : vector<16x128xf32>
    %148 = arith.mulf %146, %147 : vector<16x128xf32>
    %cst_48 = arith.constant 4.471500e-02 : f32
    %149 = vector.broadcast %cst_48 : f32 to vector<16x128xf32>
    %150 = arith.mulf %149, %148 : vector<16x128xf32>
    %151 = arith.addf %146, %150 : vector<16x128xf32>
    %cst_49 = arith.constant 0.797884583 : f32
    %152 = vector.broadcast %cst_49 : f32 to vector<16x128xf32>
    %153 = arith.mulf %152, %151 : vector<16x128xf32>
    %154 = math.tanh %153 : vector<16x128xf32>
    %cst_50 = arith.constant 1.000000e+00 : f32
    %155 = vector.broadcast %cst_50 : f32 to vector<16x128xf32>
    %156 = arith.addf %155, %154 : vector<16x128xf32>
    %cst_51 = arith.constant 5.000000e-01 : f32
    %157 = vector.broadcast %cst_51 : f32 to vector<16x128xf32>
    %158 = arith.mulf %157, %156 : vector<16x128xf32>
    %159 = arith.mulf %146, %158 : vector<16x128xf32>
    %160 = arith.truncf %159 : vector<16x128xf32> to vector<16x128xbf16>
    %cst_52 = arith.constant dense<0.000000e+00> : vector<16x32xf32>
    %161 = tpu.matmul %160, %65, %cst_52 {dimension_numbers = #tpu.dot_dimension_numbers<[1], [0], [0], [1], [0, 0, 1, 1], [], []>} : vector<16x128xbf16>, vector<128x32xbf16>, vector<16x32xf32> -> vector<16x32xf32>
    %162 = vector.extract_strided_slice %67 {offsets = [5, 0], sizes = [1, 32], strides = [1, 1]} : vector<8x128xf32> to vector<1x32xf32>
    %163 = vector.broadcast %162 : vector<1x32xf32> to vector<16x32xf32>
    %164 = arith.addf %161, %163 : vector<16x32xf32>
    %165 = arith.addf %141, %164 : vector<16x32xf32>
    %166 = vector.extract_strided_slice %67 {offsets = [6, 0], sizes = [1, 32], strides = [1, 1]} : vector<8x128xf32> to vector<1x32xf32>
    %167 = vector.extract_strided_slice %67 {offsets = [7, 0], sizes = [1, 32], strides = [1, 1]} : vector<8x128xf32> to vector<1x32xf32>
    %cst_53 = arith.constant dense<0.000000e+00> : vector<16xf32>
    %168 = vector.multi_reduction <add>, %165, %cst_53 [1] : vector<16x32xf32> to vector<16xf32>
    %169 = vector.shape_cast %168 : vector<16xf32> to vector<16x1xf32>
    %cst_54 = arith.constant 3.200000e+01 : f32
    %170 = vector.broadcast %cst_54 : f32 to vector<16x1xf32>
    %171 = arith.divf %169, %170 : vector<16x1xf32>
    %172 = vector.broadcast %171 : vector<16x1xf32> to vector<16x32xf32>
    %173 = arith.subf %165, %172 : vector<16x32xf32>
    %174 = arith.mulf %173, %173 : vector<16x32xf32>
    %cst_55 = arith.constant dense<0.000000e+00> : vector<16xf32>
    %175 = vector.multi_reduction <add>, %174, %cst_55 [1] : vector<16x32xf32> to vector<16xf32>
    %176 = vector.shape_cast %175 : vector<16xf32> to vector<16x1xf32>
    %cst_56 = arith.constant 3.200000e+01 : f32
    %177 = vector.broadcast %cst_56 : f32 to vector<16x1xf32>
    %178 = arith.divf %176, %177 : vector<16x1xf32>
    %cst_57 = arith.constant 9.99999996E-13 : f32
    %179 = vector.broadcast %cst_57 : f32 to vector<16x1xf32>
    %180 = arith.addf %178, %179 : vector<16x1xf32>
    %181 = math.rsqrt %180 : vector<16x1xf32>
    %182 = vector.broadcast %181 : vector<16x1xf32> to vector<16x32xf32>
    %183 = arith.mulf %173, %182 : vector<16x32xf32>
    %184 = vector.broadcast %166 : vector<1x32xf32> to vector<16x32xf32>
    %185 = arith.mulf %183, %184 : vector<16x32xf32>
    %186 = vector.broadcast %167 : vector<1x32xf32> to vector<16x32xf32>
    %187 = arith.addf %185, %186 : vector<16x32xf32>
    %c1_58 = arith.constant 1 : index
    %c0_59 = arith.constant 0 : index
    %c0_60 = arith.constant 0 : index
    %188 = vector.load %arg7[%c1_58, %c0_59, %c0_60] : memref<2x32x96xbf16, #tpu.memory_space<vmem>>, vector<1x32x96xbf16>
    %189 = vector.shape_cast %188 : vector<1x32x96xbf16> to vector<32x96xbf16>
    %c1_61 = arith.constant 1 : index
    %c0_62 = arith.constant 0 : index
    %c0_63 = arith.constant 0 : index
    %190 = vector.load %arg8[%c1_61, %c0_62, %c0_63] : memref<2x32x32xbf16, #tpu.memory_space<vmem>>, vector<1x32x32xbf16>
    %191 = vector.shape_cast %190 : vector<1x32x32xbf16> to vector<32x32xbf16>
    %c1_64 = arith.constant 1 : index
    %c0_65 = arith.constant 0 : index
    %c0_66 = arith.constant 0 : index
    %192 = vector.load %arg9[%c1_64, %c0_65, %c0_66] : memref<2x32x128xbf16, #tpu.memory_space<vmem>>, vector<1x32x128xbf16>
    %193 = vector.shape_cast %192 : vector<1x32x128xbf16> to vector<32x128xbf16>
    %c1_67 = arith.constant 1 : index
    %c0_68 = arith.constant 0 : index
    %c0_69 = arith.constant 0 : index
    %194 = vector.load %arg10[%c1_67, %c0_68, %c0_69] : memref<2x128x32xbf16, #tpu.memory_space<vmem>>, vector<1x128x32xbf16>
    %195 = vector.shape_cast %194 : vector<1x128x32xbf16> to vector<128x32xbf16>
    %c1_70 = arith.constant 1 : index
    %c0_71 = arith.constant 0 : index
    %c0_72 = arith.constant 0 : index
    %196 = vector.load %arg11[%c1_70, %c0_71, %c0_72] : memref<2x8x128xf32, #tpu.memory_space<vmem>>, vector<1x8x128xf32>
    %197 = vector.shape_cast %196 : vector<1x8x128xf32> to vector<8x128xf32>
    %198 = arith.truncf %187 : vector<16x32xf32> to vector<16x32xbf16>
    %cst_73 = arith.constant dense<0.000000e+00> : vector<16x96xf32>
    %199 = tpu.matmul %198, %189, %cst_73 {dimension_numbers = #tpu.dot_dimension_numbers<[1], [0], [0], [1], [0, 0, 1, 1], [], []>} : vector<16x32xbf16>, vector<32x96xbf16>, vector<16x96xf32> -> vector<16x96xf32>
    %200 = vector.extract_strided_slice %197 {offsets = [0, 0], sizes = [1, 96], strides = [1, 1]} : vector<8x128xf32> to vector<1x96xf32>
    %201 = vector.broadcast %200 : vector<1x96xf32> to vector<16x96xf32>
    %202 = arith.addf %199, %201 : vector<16x96xf32>
    %203 = vector.extract_strided_slice %202 {offsets = [0, 0], sizes = [16, 32], strides = [1, 1]} : vector<16x96xf32> to vector<16x32xf32>
    %204 = vector.extract_strided_slice %203 {offsets = [0, 0], sizes = [16, 16], strides = [1, 1]} : vector<16x32xf32> to vector<16x16xf32>
    %205 = vector.shape_cast %204 : vector<16x16xf32> to vector<2x8x16xf32>
    %206 = vector.extract_strided_slice %203 {offsets = [0, 16], sizes = [16, 16], strides = [1, 1]} : vector<16x32xf32> to vector<16x16xf32>
    %207 = vector.shape_cast %206 : vector<16x16xf32> to vector<2x8x16xf32>
    %208 = tpu.concatenate %205, %207 in 0 : vector<2x8x16xf32>, vector<2x8x16xf32> -> vector<4x8x16xf32>
    %209 = arith.truncf %208 : vector<4x8x16xf32> to vector<4x8x16xbf16>
    %210 = vector.extract_strided_slice %202 {offsets = [0, 32], sizes = [16, 32], strides = [1, 1]} : vector<16x96xf32> to vector<16x32xf32>
    %211 = vector.extract_strided_slice %210 {offsets = [0, 0], sizes = [16, 16], strides = [1, 1]} : vector<16x32xf32> to vector<16x16xf32>
    %212 = vector.shape_cast %211 : vector<16x16xf32> to vector<2x8x16xf32>
    %213 = vector.extract_strided_slice %210 {offsets = [0, 16], sizes = [16, 16], strides = [1, 1]} : vector<16x32xf32> to vector<16x16xf32>
    %214 = vector.shape_cast %213 : vector<16x16xf32> to vector<2x8x16xf32>
    %215 = tpu.concatenate %212, %214 in 0 : vector<2x8x16xf32>, vector<2x8x16xf32> -> vector<4x8x16xf32>
    %216 = arith.truncf %215 : vector<4x8x16xf32> to vector<4x8x16xbf16>
    %217 = vector.extract_strided_slice %202 {offsets = [0, 64], sizes = [16, 32], strides = [1, 1]} : vector<16x96xf32> to vector<16x32xf32>
    %218 = vector.extract_strided_slice %217 {offsets = [0, 0], sizes = [16, 16], strides = [1, 1]} : vector<16x32xf32> to vector<16x16xf32>
    %219 = vector.shape_cast %218 : vector<16x16xf32> to vector<2x8x16xf32>
    %220 = vector.extract_strided_slice %217 {offsets = [0, 16], sizes = [16, 16], strides = [1, 1]} : vector<16x32xf32> to vector<16x16xf32>
    %221 = vector.shape_cast %220 : vector<16x16xf32> to vector<2x8x16xf32>
    %222 = tpu.concatenate %219, %221 in 0 : vector<2x8x16xf32>, vector<2x8x16xf32> -> vector<4x8x16xf32>
    %223 = arith.truncf %222 : vector<4x8x16xf32> to vector<4x8x16xbf16>
    "tpu.trace_start"() <{level = 10 : i32, message = "bqd,bkd->bqk"}> : () -> ()
    %cst_74 = arith.constant dense<0.000000e+00> : vector<4x8x8xf32>
    %224 = tpu.matmul %209, %216, %cst_74 {dimension_numbers = #tpu.dot_dimension_numbers<[2], [2], [1], [1], [0, 0, 0, 1, 1, 1], [0], [0]>} : vector<4x8x16xbf16>, vector<4x8x16xbf16>, vector<4x8x8xf32> -> vector<4x8x8xf32>
    "tpu.trace_stop"() : () -> ()
    %225 = vector.broadcast %57 : vector<4x1x8xf32> to vector<4x8x8xf32>
    %226 = arith.addf %224, %225 : vector<4x8x8xf32>
    %cst_75 = arith.constant dense<0xFF800000> : vector<4x8xf32>
    %227 = vector.multi_reduction <maximumf>, %226, %cst_75 [2] : vector<4x8x8xf32> to vector<4x8xf32>
    %228 = vector.shape_cast %227 : vector<4x8xf32> to vector<4x8x1xf32>
    %229 = vector.broadcast %228 : vector<4x8x1xf32> to vector<4x8x8xf32>
    %230 = arith.subf %226, %229 : vector<4x8x8xf32>
    %231 = math.exp %230 : vector<4x8x8xf32>
    %cst_76 = arith.constant dense<0.000000e+00> : vector<4x8xf32>
    %232 = vector.multi_reduction <add>, %231, %cst_76 [2] : vector<4x8x8xf32> to vector<4x8xf32>
    %233 = vector.shape_cast %232 : vector<4x8xf32> to vector<4x8x1xf32>
    %234 = tpu.reciprocal %233 {approx = true} : vector<4x8x1xf32> -> vector<4x8x1xf32>
    %235 = vector.broadcast %234 : vector<4x8x1xf32> to vector<4x8x8xf32>
    %236 = arith.mulf %231, %235 : vector<4x8x8xf32>
    %237 = arith.truncf %236 : vector<4x8x8xf32> to vector<4x8x8xbf16>
    "tpu.trace_start"() <{level = 10 : i32, message = "bqk,bkd->bqd"}> : () -> ()
    %cst_77 = arith.constant dense<0.000000e+00> : vector<4x8x16xf32>
    %238 = tpu.matmul %237, %223, %cst_77 {dimension_numbers = #tpu.dot_dimension_numbers<[2], [1], [1], [2], [0, 0, 0, 1, 1, 2], [0], [0]>} : vector<4x8x8xbf16>, vector<4x8x16xbf16>, vector<4x8x16xf32> -> vector<4x8x16xf32>
    "tpu.trace_stop"() : () -> ()
    %239 = vector.extract_strided_slice %238 {offsets = [0, 0, 0], sizes = [2, 8, 16], strides = [1, 1, 1]} : vector<4x8x16xf32> to vector<2x8x16xf32>
    %240 = vector.shape_cast %239 : vector<2x8x16xf32> to vector<16x16xf32>
    %241 = vector.extract_strided_slice %238 {offsets = [2, 0, 0], sizes = [2, 8, 16], strides = [1, 1, 1]} : vector<4x8x16xf32> to vector<2x8x16xf32>
    %242 = vector.shape_cast %241 : vector<2x8x16xf32> to vector<16x16xf32>
    %243 = tpu.concatenate %240, %242 in 1 : vector<16x16xf32>, vector<16x16xf32> -> vector<16x32xf32>
    %244 = arith.truncf %243 : vector<16x32xf32> to vector<16x32xbf16>
    %cst_78 = arith.constant dense<0.000000e+00> : vector<16x32xf32>
    %245 = tpu.matmul %244, %191, %cst_78 {dimension_numbers = #tpu.dot_dimension_numbers<[1], [0], [0], [1], [0, 0, 1, 1], [], []>} : vector<16x32xbf16>, vector<32x32xbf16>, vector<16x32xf32> -> vector<16x32xf32>
    %246 = vector.extract_strided_slice %197 {offsets = [1, 0], sizes = [1, 32], strides = [1, 1]} : vector<8x128xf32> to vector<1x32xf32>
    %247 = vector.broadcast %246 : vector<1x32xf32> to vector<16x32xf32>
    %248 = arith.addf %245, %247 : vector<16x32xf32>
    %249 = arith.addf %187, %248 : vector<16x32xf32>
    %250 = vector.extract_strided_slice %197 {offsets = [2, 0], sizes = [1, 32], strides = [1, 1]} : vector<8x128xf32> to vector<1x32xf32>
    %251 = vector.extract_strided_slice %197 {offsets = [3, 0], sizes = [1, 32], strides = [1, 1]} : vector<8x128xf32> to vector<1x32xf32>
    %cst_79 = arith.constant dense<0.000000e+00> : vector<16xf32>
    %252 = vector.multi_reduction <add>, %249, %cst_79 [1] : vector<16x32xf32> to vector<16xf32>
    %253 = vector.shape_cast %252 : vector<16xf32> to vector<16x1xf32>
    %cst_80 = arith.constant 3.200000e+01 : f32
    %254 = vector.broadcast %cst_80 : f32 to vector<16x1xf32>
    %255 = arith.divf %253, %254 : vector<16x1xf32>
    %256 = vector.broadcast %255 : vector<16x1xf32> to vector<16x32xf32>
    %257 = arith.subf %249, %256 : vector<16x32xf32>
    %258 = arith.mulf %257, %257 : vector<16x32xf32>
    %cst_81 = arith.constant dense<0.000000e+00> : vector<16xf32>
    %259 = vector.multi_reduction <add>, %258, %cst_81 [1] : vector<16x32xf32> to vector<16xf32>
    %260 = vector.shape_cast %259 : vector<16xf32> to vector<16x1xf32>
    %cst_82 = arith.constant 3.200000e+01 : f32
    %261 = vector.broadcast %cst_82 : f32 to vector<16x1xf32>
    %262 = arith.divf %260, %261 : vector<16x1xf32>
    %cst_83 = arith.constant 9.99999996E-13 : f32
    %263 = vector.broadcast %cst_83 : f32 to vector<16x1xf32>
    %264 = arith.addf %262, %263 : vector<16x1xf32>
    %265 = math.rsqrt %264 : vector<16x1xf32>
    %266 = vector.broadcast %265 : vector<16x1xf32> to vector<16x32xf32>
    %267 = arith.mulf %257, %266 : vector<16x32xf32>
    %268 = vector.broadcast %250 : vector<1x32xf32> to vector<16x32xf32>
    %269 = arith.mulf %267, %268 : vector<16x32xf32>
    %270 = vector.broadcast %251 : vector<1x32xf32> to vector<16x32xf32>
    %271 = arith.addf %269, %270 : vector<16x32xf32>
    %272 = arith.truncf %271 : vector<16x32xf32> to vector<16x32xbf16>
    %cst_84 = arith.constant dense<0.000000e+00> : vector<16x128xf32>
    %273 = tpu.matmul %272, %193, %cst_84 {dimension_numbers = #tpu.dot_dimension_numbers<[1], [0], [0], [1], [0, 0, 1, 1], [], []>} : vector<16x32xbf16>, vector<32x128xbf16>, vector<16x128xf32> -> vector<16x128xf32>
    %274 = vector.extract_strided_slice %197 {offsets = [4, 0], sizes = [1, 128], strides = [1, 1]} : vector<8x128xf32> to vector<1x128xf32>
    %275 = vector.broadcast %274 : vector<1x128xf32> to vector<16x128xf32>
    %276 = arith.addf %273, %275 : vector<16x128xf32>
    %277 = arith.mulf %276, %276 : vector<16x128xf32>
    %278 = arith.mulf %276, %277 : vector<16x128xf32>
    %cst_85 = arith.constant 4.471500e-02 : f32
    %279 = vector.broadcast %cst_85 : f32 to vector<16x128xf32>
    %280 = arith.mulf %279, %278 : vector<16x128xf32>
    %281 = arith.addf %276, %280 : vector<16x128xf32>
    %cst_86 = arith.constant 0.797884583 : f32
    %282 = vector.broadcast %cst_86 : f32 to vector<16x128xf32>
    %283 = arith.mulf %282, %281 : vector<16x128xf32>
    %284 = math.tanh %283 : vector<16x128xf32>
    %cst_87 = arith.constant 1.000000e+00 : f32
    %285 = vector.broadcast %cst_87 : f32 to vector<16x128xf32>
    %286 = arith.addf %285, %284 : vector<16x128xf32>
    %cst_88 = arith.constant 5.000000e-01 : f32
    %287 = vector.broadcast %cst_88 : f32 to vector<16x128xf32>
    %288 = arith.mulf %287, %286 : vector<16x128xf32>
    %289 = arith.mulf %276, %288 : vector<16x128xf32>
    %290 = arith.truncf %289 : vector<16x128xf32> to vector<16x128xbf16>
    %cst_89 = arith.constant dense<0.000000e+00> : vector<16x32xf32>
    %291 = tpu.matmul %290, %195, %cst_89 {dimension_numbers = #tpu.dot_dimension_numbers<[1], [0], [0], [1], [0, 0, 1, 1], [], []>} : vector<16x128xbf16>, vector<128x32xbf16>, vector<16x32xf32> -> vector<16x32xf32>
    %292 = vector.extract_strided_slice %197 {offsets = [5, 0], sizes = [1, 32], strides = [1, 1]} : vector<8x128xf32> to vector<1x32xf32>
    %293 = vector.broadcast %292 : vector<1x32xf32> to vector<16x32xf32>
    %294 = arith.addf %291, %293 : vector<16x32xf32>
    %295 = arith.addf %271, %294 : vector<16x32xf32>
    %296 = vector.extract_strided_slice %197 {offsets = [6, 0], sizes = [1, 32], strides = [1, 1]} : vector<8x128xf32> to vector<1x32xf32>
    %297 = vector.extract_strided_slice %197 {offsets = [7, 0], sizes = [1, 32], strides = [1, 1]} : vector<8x128xf32> to vector<1x32xf32>
    %cst_90 = arith.constant dense<0.000000e+00> : vector<16xf32>
    %298 = vector.multi_reduction <add>, %295, %cst_90 [1] : vector<16x32xf32> to vector<16xf32>
    %299 = vector.shape_cast %298 : vector<16xf32> to vector<16x1xf32>
    %cst_91 = arith.constant 3.200000e+01 : f32
    %300 = vector.broadcast %cst_91 : f32 to vector<16x1xf32>
    %301 = arith.divf %299, %300 : vector<16x1xf32>
    %302 = vector.broadcast %301 : vector<16x1xf32> to vector<16x32xf32>
    %303 = arith.subf %295, %302 : vector<16x32xf32>
    %304 = arith.mulf %303, %303 : vector<16x32xf32>
    %cst_92 = arith.constant dense<0.000000e+00> : vector<16xf32>
    %305 = vector.multi_reduction <add>, %304, %cst_92 [1] : vector<16x32xf32> to vector<16xf32>
    %306 = vector.shape_cast %305 : vector<16xf32> to vector<16x1xf32>
    %cst_93 = arith.constant 3.200000e+01 : f32
    %307 = vector.broadcast %cst_93 : f32 to vector<16x1xf32>
    %308 = arith.divf %306, %307 : vector<16x1xf32>
    %cst_94 = arith.constant 9.99999996E-13 : f32
    %309 = vector.broadcast %cst_94 : f32 to vector<16x1xf32>
    %310 = arith.addf %308, %309 : vector<16x1xf32>
    %311 = math.rsqrt %310 : vector<16x1xf32>
    %312 = vector.broadcast %311 : vector<16x1xf32> to vector<16x32xf32>
    %313 = arith.mulf %303, %312 : vector<16x32xf32>
    %314 = vector.broadcast %296 : vector<1x32xf32> to vector<16x32xf32>
    %315 = arith.mulf %313, %314 : vector<16x32xf32>
    %316 = vector.broadcast %297 : vector<1x32xf32> to vector<16x32xf32>
    %317 = arith.addf %315, %316 : vector<16x32xf32>
    %c0_95 = arith.constant 0 : index
    %c0_96 = arith.constant 0 : index
    %318 = vector.load %arg14[%c0_95, %c0_96] : memref<2x128xf32, #tpu.memory_space<vmem>>, vector<2x128xf32>
    %319 = vector.shape_cast %317 : vector<16x32xf32> to vector<2x8x32xf32>
    %320 = vector.extract_strided_slice %319 {offsets = [0, 0, 0], sizes = [2, 1, 32], strides = [1, 1, 1]} : vector<2x8x32xf32> to vector<2x1x32xf32>
    %321 = vector.shape_cast %320 : vector<2x1x32xf32> to vector<2x32xf32>
    %322 = arith.truncf %321 : vector<2x32xf32> to vector<2x32xbf16>
    %c0_97 = arith.constant 0 : index
    %c0_98 = arith.constant 0 : index
    %323 = vector.load %arg12[%c0_97, %c0_98] : memref<32x32xbf16, #tpu.memory_space<vmem>>, vector<32x32xbf16>
    %cst_99 = arith.constant dense<0.000000e+00> : vector<2x32xf32>
    %324 = tpu.matmul %322, %323, %cst_99 {dimension_numbers = #tpu.dot_dimension_numbers<[1], [0], [0], [1], [0, 0, 1, 1], [], []>} : vector<2x32xbf16>, vector<32x32xbf16>, vector<2x32xf32> -> vector<2x32xf32>
    %325 = vector.extract_strided_slice %318 {offsets = [0, 0], sizes = [1, 32], strides = [1, 1]} : vector<2x128xf32> to vector<1x32xf32>
    %326 = vector.broadcast %325 : vector<1x32xf32> to vector<2x32xf32>
    %327 = arith.addf %324, %326 : vector<2x32xf32>
    %328 = math.tanh %327 : vector<2x32xf32>
    %329 = arith.truncf %328 : vector<2x32xf32> to vector<2x32xbf16>
    %c0_100 = arith.constant 0 : index
    %c0_101 = arith.constant 0 : index
    %330 = vector.load %arg13[%c0_100, %c0_101] : memref<32x128xbf16, #tpu.memory_space<vmem>>, vector<32x128xbf16>
    %cst_102 = arith.constant dense<0.000000e+00> : vector<2x128xf32>
    %331 = tpu.matmul %329, %330, %cst_102 {dimension_numbers = #tpu.dot_dimension_numbers<[1], [0], [0], [1], [0, 0, 1, 1], [], []>} : vector<2x32xbf16>, vector<32x128xbf16>, vector<2x128xf32> -> vector<2x128xf32>
    %332 = vector.extract_strided_slice %318 {offsets = [1, 0], sizes = [1, 128], strides = [1, 1]} : vector<2x128xf32> to vector<1x128xf32>
    %333 = vector.broadcast %332 : vector<1x128xf32> to vector<2x128xf32>
    %334 = arith.addf %331, %333 : vector<2x128xf32>
    %335 = tpu.iota {dimensions = array<i32: 1>} : vector<2x128xi32>
    %c2_i32 = arith.constant 2 : i32
    %336 = vector.broadcast %c2_i32 : i32 to vector<2x128xi32>
    %337 = arith.cmpi slt, %335, %336 : vector<2x128xi32>
    %cst_103 = arith.constant -1.000000e+30 : f32
    %338 = vector.broadcast %cst_103 : f32 to vector<2x128xf32>
    %339 = arith.select %337, %334, %338 : vector<2x128xi1>, vector<2x128xf32>
    %cst_104 = arith.constant dense<0xFF800000> : vector<2xf32>
    %340 = vector.multi_reduction <maximumf>, %339, %cst_104 [1] : vector<2x128xf32> to vector<2xf32>
    %341 = vector.shape_cast %340 : vector<2xf32> to vector<2x1xf32>
    %342 = vector.broadcast %341 : vector<2x1xf32> to vector<2x128xf32>
    %343 = arith.subf %339, %342 : vector<2x128xf32>
    %344 = math.exp %343 : vector<2x128xf32>
    %cst_105 = arith.constant dense<0.000000e+00> : vector<2xf32>
    %345 = vector.multi_reduction <add>, %344, %cst_105 [1] : vector<2x128xf32> to vector<2xf32>
    %346 = vector.shape_cast %345 : vector<2xf32> to vector<2x1xf32>
    %347 = vector.broadcast %346 : vector<2x1xf32> to vector<2x128xf32>
    %348 = arith.divf %344, %347 : vector<2x128xf32>
    %c0_106 = arith.constant 0 : index
    %c0_107 = arith.constant 0 : index
    %349 = vector.load %arg15[%c0_106, %c0_107] : memref<2x128xf32, #tpu.memory_space<vmem>>, vector<2x128xf32>
    tpu.vector_store %arg15[%c0_106, %c0_107], %348 {strides = array<i32>} : memref<2x128xf32, #tpu.memory_space<vmem>>, vector<2x128xf32>,
    return
  }
}

</mosaic_0001>

<bundles_post_ra>
// kernel: bmodel_forward.1
= control target key start
LH: loop header
LB: loop body
LE: loop exit
PB: predicated region body
PF: predicated region fallthrough
CT: control target
= control target key end

     0   :  { %v53_v0 = vlaneseq  ;;  %s3433_s0 = inlined_call_operand.vmem [shape: s32[2,8], index: 0, kind: input, shape index: {}]   ;;  %s3434_s1 = inlined_call_operand.vmem [shape: s32[2,8], index: 1, kind: input, shape index: {}]   ;;  %s3435_s2 = inlined_call_operand.vmem [shape: f32[2,8], index: 2, kind: input, shape index: {}]   ;;  %s3436_s3 = inlined_call_operand.vmem [shape: f32[128,32], index: 3, kind: input, shape index: {}]   ;;  %s3437_s4 = inlined_call_operand.vmem [shape: f32[2,32], index: 4, kind: input, shape index: {}]   ;;  %s3438_s5 = inlined_call_operand.vmem [shape: f32[8,32], index: 5, kind: input, shape index: {}]   ;;  %s3439_s6 = inlined_call_operand.vmem [shape: f32[2,32], index: 6, kind: input, shape index: {}]   ;;  %s3440_s7 = inlined_call_operand.vmem [shape: bf16[2,32,96], index: 7, kind: input, shape index: {}]   ;;  %s3441_s8 = inlined_call_operand.vmem [shape: bf16[2,32,32], index: 8, kind: input, shape index: {}]   ;;  %s3442_s9 = inlined_call_operand.vmem [shape: bf16[2,32,128], index: 9, kind: input, shape index: {}]   ;;  %s3443_s10 = inlined_call_operand.vmem [shape: bf16[2,128,32], index: 10, kind: input, shape index: {}]   ;;  %s3444_s11 = inlined_call_operand.vmem [shape: f32[2,8,128], index: 11, kind: input, shape index: {}]   ;;  %s3445_s12 = inlined_call_operand.vmem [shape: bf16[32,32], index: 12, kind: input, shape index: {}]   ;;  %s3446_s13 = inlined_call_operand.vmem [shape: bf16[32,128], index: 13, kind: input, shape index: {}]   ;;  %s3447_s14 = inlined_call_operand.vmem [shape: f32[2,128], index: 14, kind: input, shape index: {}]   ;;  %s3448_s15 = inlined_call_operand.hbm [shape: f32[2,128], index: 15, kind: output, shape index: {}]  }
   0x1   :  { %v75_v1 = vld [vmem:[%s3436_s3] sm:$0xff]  ;;  %v76_v2 = vld [vmem:[%s3436_s3 + $0x8] sm:$0xff]  ;;  %v77_v4 = vld [vmem:[%s3436_s3 + $0x10] sm:$0xff] }
   0x2   :  { %v2613_v3 = vpack.c.bf16 %v76_v2, %v75_v1  ;;  %v78_v5 = vld [vmem:[%s3436_s3 + $0x18] sm:$0xff]  ;;  %v2892_v6 = vshrl.u32 %v53_v0, 7  ;;  %v79_v8 = vld [vmem:[%s3436_s3 + $0x20] sm:$0xff]  ;;  %v80_v9 = vld [vmem:[%s3436_s3 + $0x28] sm:$0xff] }
   0x3   :  { %v2617_v7 = vpack.c.bf16 %v78_v5, %v77_v4  ;;  %v52_v10 = vld [vmem:[%s3433_s0] sm:$0x3]  ;;  %v2621_v13 = vpack.c.bf16 %v80_v9, %v79_v8  ;;  %v81_v16 = vld [vmem:[%s3436_s3 + $0x30] sm:$0xff]  ;;  %v82_v17 = vld [vmem:[%s3436_s3 + $0x38] sm:$0xff] }
   0x4   :  { %2614 = vmatprep.subr.bf16.mxu0 %v2613_v3  ;;  %v2904_v11 = vsub.s32 0, %v2892_v6  ;;  %v2907_v12 = vsub.s32 1, %v2892_v6  ;;  %v91_v14 = vld [vmem:[%s3434_s1] sm:$0x3]  ;;  %v2625_v21 = vpack.c.bf16 %v82_v17, %v81_v16  ;;  %v84_v22 = vld [vmem:[%s3436_s3 + $0x48] sm:$0xff]  ;;  %v85_v24 = vld [vmem:[%s3436_s3 + $0x50] sm:$0xff] }
   0x5   :  { %2616 = vmatpush3.bf16.msra.mxu0 %v2613_v3  ;;  %v83_v20 = vld [vmem:[%s3436_s3 + $0x40] sm:$0xff]  ;;  %v86_v26 = vld [vmem:[%s3436_s3 + $0x58] sm:$0xff]  ;;  %v88_v28 = vld [vmem:[%s3436_s3 + $0x68] sm:$0xff] }
   0x6   :  { %2618 = vmatprep.subr.bf16.mxu0 %v2617_v7  ;;  %v58_v15 = vrot.slane %v52_v10, %v2904_v11  ;;  %v95_v18 = vrot.slane %v91_v14, %v2904_v11  ;;  %v65_v19 = vrot.slane %v52_v10, %v2907_v12  ;;  %v102_v23 = vrot.slane %v91_v14, %v2907_v12  ;;  %v87_v27 = vld [vmem:[%s3436_s3 + $0x60] sm:$0xff]  ;;  %v89_v30 = vld [vmem:[%s3436_s3 + $0x70] sm:$0xff]  ;;  %v90_v31 = vld [vmem:[%s3436_s3 + $0x78] sm:$0xff] }
   0x7   :  { %v2629_v25 = vpack.c.bf16 %v84_v22, %v83_v20  ;;  %v2633_v29 = vpack.c.bf16 %v86_v26, %v85_v24  ;;  %v2637_v32 = vpack.c.bf16 %v88_v28, %v87_v27  ;;  %v2641_v33 = vpack.c.bf16 %v90_v31, %v89_v30 }
   0x8   :  { %60 = vbcast.lane.b32.xlu0 %v58_v15, 256  ;;  %97 = vbcast.lane.b32.xlu1 %v95_v18, 256 }
   0x9   :  { %2620 = vmatpush3.bf16.msra.mxu0 %v2617_v7 }
   0xa   :  { %2622 = vmatprep.subr.bf16.mxu0 %v2621_v13 }
   0xc   :  { %67 = vbcast.lane.b32.xlu0 %v65_v19, 256  ;;  %104 = vbcast.lane.b32.xlu1 %v102_v23, 256 }
   0xd   :  { %2624 = vmatpush3.bf16.msra.mxu0 %v2621_v13 }
   0xe   :  { %2626 = vmatprep.subr.bf16.mxu0 %v2625_v21 }
  0x11   :  { %2628 = vmatpush3.bf16.msra.mxu0 %v2625_v21 }
  0x12   :  { %2630 = vmatprep.subr.bf16.mxu0 %v2629_v25 }
  0x15   :  { %2632 = vmatpush3.bf16.msra.mxu0 %v2629_v25 }
  0x16   :  { %2634 = vmatprep.subr.bf16.mxu0 %v2633_v29 }
  0x19   :  { %2636 = vmatpush3.bf16.msra.mxu0 %v2633_v29 }
  0x1a   :  { %2638 = vmatprep.subr.bf16.mxu0 %v2637_v32 }
  0x1d   :  { %2640 = vmatpush3.bf16.msra.mxu0 %v2637_v32 }
  0x1e   :  { %2642 = vmatprep.subr.bf16.mxu0 %v2641_v33 }
  0x1f   :  { %20 = vsyncpa [#allocation3], 0  ;;  %v2946_v34 = vand.u32 127, %v53_v0  ;;  %v2791_v36 = vmov 1.0   ;;  %v2197_v40 = vld [vmem:[%s3437_s4] ss:$0 sm:$0xff] }
  0x20   :  { %v2198_v41 = vld [vmem:[%s3437_s4 + $0x1] ss:$0 sm:$0xff]  ;;  %vm203_vm4 = vcmask 261120   ;;  %v2792_v0 = vmov 0.0   ;;  %v2670_v1 = vld [vmem:[%s3440_s7 + $0x8] sm:$0xff]   ;;  %vm2793_vm5 = vmmov 0  }
  0x21   :  { %2644 = vmatpush3.bf16.msra.mxu0 %v2641_v33  ;;  %v124_v45 = vld [vmem:[%s3438_s5] sm:$0xff]  ;;  %2413 = vmatprep.subr.bf16.mxu1 %v2792_v0  ;;  %s2794_s30 = smov 112   ;;  %s2795_s16 = smov 96   ;;  %vm401_vm6 = vcmask 130048   ;;  %vm249_vm7 = vcmask 1041408   ;;  %vm595_vm8 = vcmask 64512  }
  0x22   :  { %v2669_v63 = vld [vmem:[%s3440_s7] sm:$0xff]   ;;  %2451 = vmatprep.subr.bf16.mxu0 %v2792_v0  ;;  %2417 = vmatprep.mubr.msk.bf16.mxu1 %vm2793_vm5, %v2792_v0  ;;  %vm649_vm9 = vcmask 1043456   ;;  %s2798_s21 = smov 16   ;;  %vm2044_vm10 = vcmask 1041409   ;;  %vm2167_vm11 = vcmp.lt.s32.totalorder %v2946_v34, 2 }
  0x23   :  { %2414 = vmatpush3.bf16.msra.mxu1 %v2669_v63  ;;  %v125_v9 = vld [vmem:[%s3439_s6] sm:$0x3] }
  0x24   :  { %2415 = vmatprep.subr.bf16.mxu1 %v2792_v0  ;;  %v234_v14 = vrot.slane %v125_v9, %v2904_v11  ;;  %v240_v18 = vrot.slane %v125_v9, %v2907_v12  ;;  %v2994_v23 = vld [vmem:[%s3444_s11] sm:$0xff] }
  0x25   :  { %v309_v24 = vrot.slane %v2994_v23, %v2904_v11 }
  0x27   :  { %2416 = vmatpush3.bf16.msra.mxu1 %v2670_v1 }
  0x28   :  { %2421 = vmatprep.subr.bf16.mxu1 %v2792_v0 }
  0x7a   :  { %v61_v35 = vpop.permute.xlu0 %60  ;;  %v98_v38 = vpop.permute.xlu1 %97 }
  0x7b   :  { %vm69_vm0 = vcmp.eq.s32.totalorder %v61_v35, %v2946_v34  ;;  %vm106_vm3 = vcmp.eq.s32.totalorder %v98_v38, 0 }
  0x7c   :  { %2410 = vmatprep.mubr.msk.f32.mxu0 %vm69_vm0, %v2791_v36  ;;  %v122_v43 = vsel %vm106_vm3, %v2197_v40, %v2198_v41 }
  0x7e   :  { %v68_v37 = vpop.permute.xlu0 %67  ;;  %v105_v39 = vpop.permute.xlu1 %104 }
  0x7f   :  { %vm70_vm1 = vcmp.eq.s32.totalorder %v68_v37, %v2946_v34  ;;  %vm107_vm2 = vcmp.eq.s32.totalorder %v105_v39, 0 }
  0x80   :  { %2411 = vmatmul.mubr.msk.f32.vlgmr.msra.gmra.mrb[0].mxu0 %vm70_vm1, %v2791_v36  ;;  %v123_v42 = vsel %vm107_vm2, %v2197_v40, %v2198_v41 }
  0x81   :  { %2453 = vmatprep.mubr.msk.bf16.mxu0 %vm2793_vm5, %v2792_v0 }
 0x153   :  { %v2412_v44 = vpop.f32.mrb[0].mxu0 }
 0x154   :  { %v198_v46 = vadd.f32 %v2412_v44, %v123_v42  ;;  %v192_v47 = vpop.f32.mrb[1].mxu0 }
 0x155   :  { %v193_v48 = vadd.f32 %v192_v47, %v122_v43 }
 0x156   :  { %v202_v49 = vadd.f32 %v198_v46, %v124_v45  ;;  %v243_v46 = vld [vmem:[%s3435_s2] sm:$0x3]  ;;  %s2797_s2 = smov 64  }
 0x157   :  { %v201_v50 = vadd.f32 %v193_v48, %v124_v45  ;;  %v244_v47 = vsub.f32 1.0, %v243_v46  ;;  %v2796_v48 = vmov 1966171168  }
 0x158   :  { %v207_v51 = vsel %vm203_vm4, %v202_v49, 0.0 }
 0x159   :  { %208 = vadd.xlane.f32.xlu1 %v207_v51  ;;  %v204_v52 = vsel %vm203_vm4, %v201_v50, 0.0 }
 0x15a   :  { %205 = vadd.xlane.f32.xlu0 %v204_v52 }
 0x1e6   :  { %v209_v53 = vpop.xlane.xlu1 %208 }
 0x1e7   :  { %v212_v54 = vmul.f32 0.03125, %v209_v53  ;;  %v206_v55 = vpop.xlane.xlu0 %205 }
 0x1e8   :  { %v211_v56 = vmul.f32 0.03125, %v206_v55 }
 0x1e9   :  { %v214_v57 = vsub.f32 %v202_v49, %v212_v54  ;;  %v253_v49 = vunpack.c.l.s4 %v2796_v48 }
 0x1ea   :  { %v213_v58 = vsub.f32 %v201_v50, %v211_v56  ;;  %v245_v50 = vmul.f32 -10000.0, %v244_v47 }
 0x1eb   :  { %v216_v61 = vmul.f32 %v214_v57, %v214_v57  ;;  %v254_v51 = vunpack.c.0.s8 %v253_v49 }
 0x1ec   :  { %v215_v59 = vmul.f32 %v213_v58, %v213_v58  ;;  %v247_v52 = vrot.slane %v245_v50, 6 }
 0x1ed   :  { %v220_v62 = vsel %vm203_vm4, %v216_v61, 0.0  ;;  %v257_v53 = vsub.s32 %v254_v51, %v2892_v6 }
 0x1ee   :  { %v217_v60 = vsel %vm203_vm4, %v215_v59, 0.0  ;;  %v250_v54 = vsel %vm249_vm7, %v245_v50, %v247_v52 }
 0x1ef   :  { %218 = vadd.xlane.f32.xlu0 %v217_v60  ;;  %v258_v55 = vrot.slane %v250_v54, %v257_v53 }
 0x1f1   :  { %v266_v56 = vrot.slane %v258_v55, %v257_v53 }
 0x1f3   :  { %221 = vadd.xlane.f32.xlu0 %v220_v62 }
 0x27c   :  { %v219_v2 = vpop.xlane.xlu0 %218 }
 0x27d   :  { %v223_v3 = vmul.f32 0.03125, %v219_v2 }
 0x27f   :  { %v225_v4 = vadd.f32 1e-12, %v223_v3 }
 0x280   :  { %v222_v5 = vpop.xlane.xlu0 %221 }
 0x281   :  { %2701 = vrsqrt.f32 %v225_v4  ;;  %v224_v7 = vmul.f32 0.03125, %v222_v5 }
 0x283   :  { %v226_v8 = vadd.f32 1e-12, %v224_v7 }
 0x285   :  { %2703 = vrsqrt.f32 %v226_v8 }
 0x28b   :  { %v2702_v10 = vpop.eup %2701 }
 0x28c   :  { %v229_v13 = vmul.f32 %v2702_v10, %v213_v58  ;;  %v259_v58 = vcombine.high %v258_v55, %v258_v55 }
 0x28e   :  { %v235_v17 = vmul.f32 %v234_v14, %v229_v13  ;;  %v273_v62 = vrot.slane %v259_v58, %v257_v53  ;;  %v274_v13 = vcombine.high %v266_v56, %v266_v56 }
 0x28f   :  { %v2704_v15 = vpop.eup %2703 }
 0x290   :  { %v230_v16 = vmul.f32 %v2704_v15, %v214_v57  ;;  %v2982_v20 = vadd.f32 %v240_v18, %v235_v17  ;;  %v3046_v57 = vrot.slane %v266_v56, %v2904_v11  ;;  %v3051_v3 = vrot.slane %v273_v62, %v2904_v11 }
 0x292   :  { %v236_v19 = vmul.f32 %v234_v14, %v230_v16  ;;  %v3058_v14 = vrot.slane %v274_v13, %v2904_v11 }
 0x294   :  { %v2984_v21 = vadd.f32 %v240_v18, %v236_v19  ;;  %v275_v18 = vcombine.high %v273_v62, %v273_v62 }
 0x296   :  { %v305_v22 = vpack.c.bf16 %v2984_v21, %v2982_v20 }
 0x298   :  { %2418 = vmatmul.mubr.msk.bf16.vlgmr.msra.gmra.mrb[0].mxu1 %vm203_vm4, %v305_v22 }
 0x299   :  { %2423 = vmatprep.mubr.msk.bf16.mxu1 %vm2793_vm5, %v2792_v0 }
 0x36b   :  { %v359_v25 = vpop.f32.mrb[0].mxu1 }
 0x36c   :  { %v360_v26 = vadd.f32 %v359_v25, %v309_v24  ;;  %v2419_v27 = vpop.f32.mrb[1].mxu1  ;;  %v3063_v25 = vrot.slane %v275_v18, %v2904_v11 }
 0x36d   :  { %v362_v28 = vpop.f32.mrb[2].mxu1 }
 0x36e   :  { %v363_v29 = vadd.f32 %v362_v28, %v309_v24  ;;  %368 = vrot.lane.b32.xlu1 %v360_v26, %s2794_s30  ;;  %v2420_v30 = vpop.f32.mrb[3].mxu1  ;;  %v2999_v31 = vpack.c.bf16 %v360_v26, %v360_v26 }
 0x370   :  { %370 = vrot.lane.b32.xlu0 %v363_v29, %s2794_s30  ;;  %v3004_v32 = vpack.c.bf16 %v363_v29, %v363_v29 }
 0x372   :  { %399 = vrot.lane.b32.xlu1 %v2999_v31, %s2795_s16 }
 0x376   :  { %449 = vrot.lane.b32.xlu1 %v3004_v32, %s2795_s16 }
 0x3e0   :  { %v369_v33 = vpop.permute.xlu1 %368 }
 0x3e1   :  { %v3008_v35 = vpack.c.bf16 %v369_v33, %v369_v33 }
 0x3e2   :  { %v371_v36 = vpop.permute.xlu0 %370 }
 0x3e3   :  { %v3010_v37 = vpack.c.bf16 %v371_v36, %v371_v36  ;;  %498 = vrot.lane.b32.xlu0 %v3008_v35, %s2795_s16 }
 0x3e4   :  { %v400_v38 = vpop.permute.xlu1 %399 }
 0x3e5   :  { %v406_v39 = vsel %vm401_vm6, %v400_v38, 0  ;;  %547 = vrot.lane.b32.xlu1 %v3010_v37, %s2795_s16 }
 0x3e6   :  { %2422 = vmatpush3.bf16.xpose.msra.mxu1 %v406_v39 }
 0x3e7   :  { %2427 = vmatprep.subr.bf16.mxu1 %v2792_v0 }
 0x3e8   :  { %v450_v40 = vpop.permute.xlu1 %449 }
 0x3e9   :  { %v455_v41 = vsel %vm401_vm6, %v450_v40, 0 }
 0x3ed   :  { %2424 = vmatmul.mubr.msk.bf16.vlgmr.msra.gmra.mrb[4].mxu1 %vm401_vm6, %v2999_v31 }
 0x3ee   :  { %2428 = vmatpush3.bf16.xpose.msra.mxu1 %v455_v41  ;;  %2429 = vmatprep.mubr.msk.bf16.mxu1 %vm2793_vm5, %v2792_v0 }
 0x3ef   :  { %2433 = vmatprep.subr.bf16.mxu1 %v2792_v0 }
 0x3f5   :  { %2430 = vmatmul.mubr.msk.bf16.vlgmr.msra.gmra.mrb[8].mxu1 %vm401_vm6, %v3004_v32 }
 0x3f6   :  { %2435 = vmatprep.mubr.msk.bf16.mxu1 %vm2793_vm5, %v2792_v0 }
 0x455   :  { %v499_v42 = vpop.permute.xlu0 %498 }
 0x456   :  { %v504_v43 = vsel %vm401_vm6, %v499_v42, 0 }
 0x457   :  { %2434 = vmatpush3.bf16.xpose.msra.mxu1 %v504_v43  ;;  %v548_v44 = vpop.permute.xlu1 %547 }
 0x458   :  { %2439 = vmatprep.subr.bf16.mxu1 %v2792_v0  ;;  %v553_v45 = vsel %vm401_vm6, %v548_v44, 0 }
 0x45e   :  { %2436 = vmatmul.mubr.msk.bf16.vlgmr.msra.gmra.mrb[12].mxu1 %vm401_vm6, %v3008_v35 }
 0x45f   :  { %2440 = vmatpush3.bf16.xpose.msra.mxu1 %v553_v45  ;;  %2441 = vmatprep.mubr.msk.bf16.mxu1 %vm2793_vm5, %v2792_v0 }
 0x460   :  { %2445 = vmatprep.subr.bf16.mxu1 %v2792_v0 }
 0x466   :  { %2442 = vmatmul.mubr.msk.bf16.vlgmr.msra.gmra.mrb[16].mxu1 %vm401_vm6, %v3010_v37 }
 0x467   :  { %2447 = vmatprep.mubr.msk.bf16.mxu1 %vm2793_vm5, %v2792_v0 }
 0x4c0   :  { %v442_v59 = vpop.f32.mrb[4].mxu1 }
 0x4c1   :  { %v443_v60 = vadd.f32 %v442_v59, %v3046_v57  ;;  %v2425_v61 = vpop.f32.mrb[5].mxu1 }
 0x4c2   :  { %v445_v63 = vpop.f32.mrb[6].mxu1 }
 0x4c3   :  { %v2426_v1 = vpop.f32.mrb[7].mxu1  ;;  %v596_v2 = vsel %vm595_vm8, %v443_v60, -inf }
 0x4c4   :  { %597 = vmax.xlane.f32.xlu0 %v596_v2 }
 0x4c8   :  { %v491_v4 = vpop.f32.mrb[8].mxu1 }
 0x4c9   :  { %v492_v5 = vadd.f32 %v491_v4, %v3051_v3  ;;  %v2431_v7 = vpop.f32.mrb[9].mxu1 }
 0x4ca   :  { %v494_v8 = vpop.f32.mrb[10].mxu1 }
 0x4cb   :  { %v2432_v9 = vpop.f32.mrb[11].mxu1  ;;  %v599_v10 = vsel %vm595_vm8, %v492_v5, -inf }
 0x4cc   :  { %600 = vmax.xlane.f32.xlu1 %v599_v10 }
 0x4dd   :  { %644 = vrot.lane.b32.xlu1 %v2999_v31, %s2797_s2 }
 0x531   :  { %v540_v15 = vpop.f32.mrb[12].mxu1 }
 0x532   :  { %v541_v16 = vadd.f32 %v540_v15, %v3058_v14  ;;  %v2437_v17 = vpop.f32.mrb[13].mxu1 }
 0x533   :  { %v543_v19 = vpop.f32.mrb[14].mxu1 }
 0x534   :  { %v2438_v22 = vpop.f32.mrb[15].mxu1  ;;  %v602_v24 = vsel %vm595_vm8, %v541_v16, -inf }
 0x535   :  { %603 = vmax.xlane.f32.xlu0 %v602_v24  ;;  %v2671_v22 = vld [vmem:[%s3441_s8] sm:$0xff]  }
 0x539   :  { %v589_v26 = vpop.f32.mrb[16].mxu1 }
 0x53a   :  { %v590_v27 = vadd.f32 %v589_v26, %v3063_v25  ;;  %v2443_v28 = vpop.f32.mrb[17].mxu1 }
 0x53b   :  { %v592_v29 = vpop.f32.mrb[18].mxu1 }
 0x53c   :  { %v2444_v30 = vpop.f32.mrb[19].mxu1  ;;  %v605_v31 = vsel %vm595_vm8, %v590_v27, -inf  ;;  %v2672_v29 = vld [vmem:[%s3441_s8 + $0x8] sm:$0xff]  }
 0x53d   :  { %606 = vmax.xlane.f32.xlu0 %v605_v31 }
 0x551   :  { %v598_v33 = vpop.xlane.xlu0 %597 }
 0x552   :  { %v608_v36 = vsub.f32 %v443_v60, %v598_v33 }
 0x554   :  { %v612_v38 = vmul.f32 1.442695, %v608_v36 }
 0x556   :  { %2705 = vpow2.f32 %v612_v38 }
 0x559   :  { %v601_v39 = vpop.xlane.xlu1 %600 }
 0x55a   :  { %v609_v40 = vsub.f32 %v492_v5, %v601_v39 }
 0x55c   :  { %v614_v41 = vmul.f32 1.442695, %v609_v40 }
 0x55d   :  { %v645_v42 = vpop.permute.xlu1 %644 }
 0x55e   :  { %2707 = vpow2.f32 %v614_v41  ;;  %v651_v43 = vsel %vm649_vm9, %v645_v42, 0 }
 0x55f   :  { %2446 = vmatpush3.bf16.msra.mxu1 %v651_v43 }
 0x560   :  { %v2706_v44 = vpop.eup %2705  ;;  %2457 = vmatprep.subr.bf16.mxu1 %v2792_v0 }
 0x561   :  { %v620_v45 = vsel %vm595_vm8, %v2706_v44, 0.0 }
 0x562   :  { %621 = vadd.xlane.f32.xlu1 %v620_v45 }
 0x568   :  { %v2708_v46 = vpop.eup %2707 }
 0x569   :  { %v623_v47 = vsel %vm595_vm8, %v2708_v46, 0.0 }
 0x56a   :  { %624 = vadd.xlane.f32.xlu0 %v623_v47 }
 0x5c2   :  { %v604_v48 = vpop.xlane.xlu0 %603 }
 0x5c3   :  { %v610_v49 = vsub.f32 %v541_v16, %v604_v48 }
 0x5c5   :  { %v616_v50 = vmul.f32 1.442695, %v610_v49 }
 0x5c7   :  { %2709 = vpow2.f32 %v616_v50 }
 0x5ca   :  { %v607_v51 = vpop.xlane.xlu0 %606 }
 0x5cb   :  { %v611_v52 = vsub.f32 %v590_v27, %v607_v51 }
 0x5cd   :  { %v618_v53 = vmul.f32 1.442695, %v611_v52 }
 0x5cf   :  { %2711 = vpow2.f32 %v618_v53  ;;  %v851_v53 = vrot.slane %v2994_v23, %v2907_v12 }
 0x5d1   :  { %v2710_v54 = vpop.eup %2709 }
 0x5d2   :  { %v626_v55 = vsel %vm595_vm8, %v2710_v54, 0.0 }
 0x5d3   :  { %627 = vadd.xlane.f32.xlu1 %v626_v55 }
 0x5d9   :  { %v2712_v56 = vpop.eup %2711 }
 0x5da   :  { %v629_v58 = vsel %vm595_vm8, %v2712_v56, 0.0 }
 0x5db   :  { %630 = vadd.xlane.f32.xlu0 %v629_v58 }
 0x5e4   :  { %741 = vrot.lane.b32.xlu1 %v3008_v35, %s2797_s2 }
 0x5e8   :  { %789 = vrot.lane.b32.xlu1 %v3010_v37, %s2797_s2 }
 0x5ef   :  { %v622_v59 = vpop.xlane.xlu1 %621 }
 0x5f0   :  { %2713 = vrcp.f32 %v622_v59 }
 0x5f1   :  { %693 = vrot.lane.b32.xlu0 %v3004_v32, %s2797_s2 }
 0x5f7   :  { %v625_v63 = vpop.xlane.xlu0 %624 }
 0x5f8   :  { %2715 = vrcp.f32 %v625_v63 }
 0x5fa   :  { %v2714_v60 = vpop.eup %2713 }
 0x5fb   :  { %v636_v61 = vmul.f32 %v2714_v60, %v2706_v44 }
 0x5fd   :  { %v640_v62 = vpack.c.bf16 %v636_v61, %v636_v61 }
 0x5ff   :  { %2448 = vmatmul.mubr.msk.bf16.vlgmr.msra.gmra.mrb[20].mxu1 %vm595_vm8, %v640_v62 }
 0x600   :  { %2459 = vmatprep.mubr.msk.bf16.mxu1 %vm2793_vm5, %v2792_v0 }
 0x602   :  { %v2716_v2 = vpop.eup %2715 }
 0x603   :  { %v637_v5 = vmul.f32 %v2716_v2, %v2708_v46 }
 0x605   :  { %v641_v15 = vpack.c.bf16 %v637_v5, %v637_v5 }
 0x660   :  { %v628_v1 = vpop.xlane.xlu1 %627 }
 0x661   :  { %2717 = vrcp.f32 %v628_v1 }
 0x664   :  { %v742_v35 = vpop.permute.xlu1 %741 }
 0x665   :  { %v747_v37 = vsel %vm649_vm9, %v742_v35, 0 }
 0x666   :  { %2458 = vmatpush3.bf16.msra.mxu1 %v747_v37 }
 0x667   :  { %2469 = vmatprep.subr.bf16.mxu1 %v2792_v0 }
 0x668   :  { %v631_v32 = vpop.xlane.xlu0 %630  ;;  %v790_v10 = vpop.permute.xlu1 %789 }
 0x669   :  { %2719 = vrcp.f32 %v631_v32  ;;  %v795_v16 = vsel %vm649_vm9, %v790_v10, 0  ;;  %v2674_v10 = vld [vmem:[%s3442_s9 + $0x8] sm:$0xff]  }
 0x66b   :  { %v2718_v4 = vpop.eup %2717 }
 0x66c   :  { %v638_v7 = vmul.f32 %v2718_v4, %v2710_v54  ;;  %v694_v8 = vpop.permute.xlu0 %693 }
 0x66d   :  { %v699_v9 = vsel %vm649_vm9, %v694_v8, 0 }
 0x66e   :  { %2452 = vmatpush3.bf16.msra.mxu0 %v699_v9  ;;  %v642_v13 = vpack.c.bf16 %v638_v7, %v638_v7 }
 0x66f   :  { %2463 = vmatprep.subr.bf16.mxu0 %v2792_v0 }
 0x670   :  { %2460 = vmatmul.mubr.msk.bf16.vlgmr.msra.gmra.mrb[24].mxu1 %vm595_vm8, %v642_v13 }
 0x671   :  { %2454 = vmatmul.mubr.msk.bf16.vlgmr.msra.gmra.mrb[4].mxu0 %vm595_vm8, %v641_v15  ;;  %2473 = vmatprep.mubr.msk.bf16.mxu1 %vm2793_vm5, %v2792_v0 }
 0x672   :  { %2464 = vmatpush3.bf16.msra.mxu0 %v795_v16  ;;  %2465 = vmatprep.mubr.msk.bf16.mxu0 %vm2793_vm5, %v2792_v0 }
 0x673   :  { %v2720_v17 = vpop.eup %2719  ;;  %2477 = vmatprep.subr.bf16.mxu0 %v2792_v0  ;;  %2470 = vmatpush3.bf16.msra.mxu1 %v2671_v22  ;;  %v938_v22 = vsub.s32 2, %v2892_v6 }
 0x674   :  { %v639_v18 = vmul.f32 %v2720_v17, %v2712_v56  ;;  %2471 = vmatprep.subr.bf16.mxu1 %v2792_v0 }
 0x676   :  { %v643_v19 = vpack.c.bf16 %v639_v18, %v639_v18 }
 0x677   :  { %2472 = vmatpush3.bf16.msra.mxu1 %v2672_v29 }
 0x678   :  { %2485 = vmatprep.subr.bf16.mxu1 %v2792_v0 }
 0x679   :  { %2466 = vmatmul.mubr.msk.bf16.vlgmr.msra.gmra.mrb[8].mxu0 %vm595_vm8, %v643_v19 }
 0x67a   :  { %2481 = vmatprep.mubr.msk.bf16.mxu0 %vm2793_vm5, %v2792_v0 }
 0x6d2   :  { %v687_v24 = vpop.f32.mrb[20].mxu1 }
 0x6d3   :  { %v2449_v26 = vpop.f32.mrb[21].mxu1 }
 0x6d4   :  { %v690_v27 = vpop.f32.mrb[22].mxu1  ;;  %v944_v26 = vsub.s32 3, %v2892_v6 }
 0x6d5   :  { %v2450_v28 = vpop.f32.mrb[23].mxu1 }
 0x743   :  { %v783_v30 = vpop.f32.mrb[24].mxu1 }
 0x744   :  { %v735_v31 = vpop.f32.mrb[4].mxu0  ;;  %v2461_v33 = vpop.f32.mrb[25].mxu1 }
 0x745   :  { %v2455_v36 = vpop.f32.mrb[5].mxu0  ;;  %v786_v38 = vpop.f32.mrb[26].mxu1  ;;  %v945_v33 = vrot.slane %v2994_v23, %v944_v26 }
 0x746   :  { %v738_v39 = vpop.f32.mrb[6].mxu0  ;;  %v2462_v40 = vpop.f32.mrb[27].mxu1 }
 0x747   :  { %v2456_v41 = vpop.f32.mrb[7].mxu0 }
 0x748   :  { %v2675_v41 = vld [vmem:[%s3443_s10] sm:$0xff]  }
 0x74c   :  { %v831_v42 = vpop.f32.mrb[8].mxu0 }
 0x74d   :  { %v2654_v43 = vpack.i.bf16 %v831_v42, %v783_v30  ;;  %v2467_v44 = vpop.f32.mrb[9].mxu0  ;;  %v2676_v42 = vld [vmem:[%s3443_s10 + $0x8] sm:$0xff]  }
 0x74e   :  { %v834_v45 = vpop.f32.mrb[10].mxu0  ;;  %v2678_v44 = vld [vmem:[%s3443_s10 + $0x18] sm:$0xff]  }
 0x74f   :  { %v2468_v46 = vpop.f32.mrb[11].mxu0  ;;  %2655 = vrot.lane.b32.xlu0 %v2654_v43, %s2798_s21  ;;  %v2677_v43 = vld [vmem:[%s3443_s10 + $0x10] sm:$0xff]   ;;  %v2679_v45 = vld [vmem:[%s3443_s10 + $0x20] sm:$0xff]  }
 0x750   :  { %v2680_v46 = vld [vmem:[%s3443_s10 + $0x28] sm:$0xff]  }
 0x7c1   :  { %v2656_v47 = vpop.permute.xlu0 %2655 }
 0x7c2   :  { %v2658_v48 = vunpack.i.h.bf16 %v2656_v47  ;;  %v2657_v49 = vunpack.i.l.bf16 %v2656_v47  ;;  %v2681_v47 = vld [vmem:[%s3443_s10 + $0x30] sm:$0xff]  }
 0x7c4   :  { %v846_v50 = vsel %vm401_vm6, %v735_v31, %v2658_v48  ;;  %v845_v51 = vsel %vm401_vm6, %v687_v24, %v2657_v49  ;;  %v939_v24 = vrot.slane %v2994_v23, %v938_v22  ;;  %v2682_v48 = vld [vmem:[%s3443_s10 + $0x38] sm:$0xff]   ;;  %v951_v49 = vsub.s32 4, %v2892_v6 }
 0x7c5   :  { %v847_v52 = vpack.c.bf16 %v846_v50, %v845_v51 }
 0x7c6   :  { %v952_v50 = vrot.slane %v2994_v23, %v951_v49 }
 0x7c7   :  { %2474 = vmatmul.mubr.msk.bf16.vlgmr.msra.gmra.mrb[28].mxu1 %vm203_vm4, %v847_v52 }
 0x7c8   :  { %2501 = vmatprep.mubr.msk.bf16.mxu1 %vm2793_vm5, %v2792_v0  ;;  %2486 = vmatpush3.bf16.msra.mxu1 %v2675_v41 }
 0x7c9   :  { %2487 = vmatprep.subr.bf16.mxu1 %v2792_v0 }
 0x7cc   :  { %2488 = vmatpush3.bf16.msra.mxu1 %v2676_v42 }
 0x7cd   :  { %2489 = vmatprep.subr.bf16.mxu1 %v2792_v0 }
 0x7d0   :  { %2490 = vmatpush3.bf16.msra.mxu1 %v2677_v43 }
 0x7d1   :  { %2491 = vmatprep.subr.bf16.mxu1 %v2792_v0 }
 0x7d4   :  { %2492 = vmatpush3.bf16.msra.mxu1 %v2678_v44 }
 0x7d5   :  { %2493 = vmatprep.subr.bf16.mxu1 %v2792_v0 }
 0x7d8   :  { %2494 = vmatpush3.bf16.msra.mxu1 %v2679_v45 }
 0x7d9   :  { %2495 = vmatprep.subr.bf16.mxu1 %v2792_v0 }
 0x7dc   :  { %2496 = vmatpush3.bf16.msra.mxu1 %v2680_v46 }
 0x7dd   :  { %2497 = vmatprep.subr.bf16.mxu1 %v2792_v0 }
 0x7e0   :  { %2498 = vmatpush3.bf16.msra.mxu1 %v2681_v47  ;;  %v2684_v47 = vld [vmem:[%s3440_s7 + $0x18] sm:$0xff]  }
 0x7e1   :  { %2499 = vmatprep.subr.bf16.mxu1 %v2792_v0 }
 0x7e4   :  { %2500 = vmatpush3.bf16.msra.mxu1 %v2682_v48 }
 0x7e5   :  { %2531 = vmatprep.subr.bf16.mxu1 %v2792_v0 }
 0x89a   :  { %v901_v54 = vpop.f32.mrb[28].mxu1 }
 0x89b   :  { %v902_v55 = vadd.f32 %v901_v54, %v851_v53  ;;  %v2475_v56 = vpop.f32.mrb[29].mxu1 }
 0x89c   :  { %v904_v58 = vpop.f32.mrb[30].mxu1 }
 0x89d   :  { %v905_v59 = vadd.f32 %v904_v58, %v851_v53  ;;  %v2476_v60 = vpop.f32.mrb[31].mxu1  ;;  %v908_v61 = vadd.f32 %v902_v55, %v2982_v20 }
 0x89f   :  { %v910_v62 = vsel %vm203_vm4, %v908_v61, 0.0  ;;  %v909_v63 = vadd.f32 %v905_v59, %v2984_v21  ;;  %v2673_v21 = vld [vmem:[%s3442_s9] sm:$0xff]  }
 0x8a0   :  { %911 = vadd.xlane.f32.xlu1 %v910_v62  ;;  %2478 = vmatpush3.bf16.msra.mxu0 %v2673_v21 }
 0x8a1   :  { %v913_v1 = vsel %vm203_vm4, %v909_v63, 0.0  ;;  %2479 = vmatprep.subr.bf16.mxu0 %v2792_v0 }
 0x8a2   :  { %914 = vadd.xlane.f32.xlu0 %v913_v1 }
 0x8a4   :  { %2480 = vmatpush3.bf16.msra.mxu0 %v2674_v10 }
 0x8a5   :  { %2505 = vmatprep.subr.bf16.mxu0 %v2792_v0 }
 0x92d   :  { %v912_v35 = vpop.xlane.xlu1 %911 }
 0x92e   :  { %v916_v37 = vmul.f32 0.03125, %v912_v35 }
 0x92f   :  { %v915_v2 = vpop.xlane.xlu0 %914 }
 0x930   :  { %v918_v32 = vsub.f32 %v908_v61, %v916_v37  ;;  %v917_v4 = vmul.f32 0.03125, %v915_v2 }
 0x932   :  { %v919_v5 = vsub.f32 %v909_v63, %v917_v4  ;;  %v920_v7 = vmul.f32 %v918_v32, %v918_v32 }
 0x934   :  { %v922_v8 = vsel %vm203_vm4, %v920_v7, 0.0  ;;  %v921_v9 = vmul.f32 %v919_v5, %v919_v5 }
 0x935   :  { %923 = vadd.xlane.f32.xlu0 %v922_v8 }
 0x936   :  { %v925_v20 = vsel %vm203_vm4, %v921_v9, 0.0 }
 0x937   :  { %926 = vadd.xlane.f32.xlu1 %v925_v20 }
 0x9c2   :  { %v924_v13 = vpop.xlane.xlu0 %923 }
 0x9c3   :  { %v928_v15 = vmul.f32 0.03125, %v924_v13  ;;  %v1030_v13 = vsub.s32 5, %v2892_v6 }
 0x9c4   :  { %v927_v16 = vpop.xlane.xlu1 %926 }
 0x9c5   :  { %v930_v17 = vadd.f32 1e-12, %v928_v15  ;;  %v929_v18 = vmul.f32 0.03125, %v927_v16  ;;  %v1031_v15 = vrot.slane %v2994_v23, %v1030_v13 }
 0x9c7   :  { %2721 = vrsqrt.f32 %v930_v17  ;;  %v931_v19 = vadd.f32 1e-12, %v929_v18 }
 0x9c9   :  { %2723 = vrsqrt.f32 %v931_v19 }
 0x9d1   :  { %v2722_v27 = vpop.eup %2721 }
 0x9d2   :  { %v934_v28 = vmul.f32 %v2722_v27, %v918_v32 }
 0x9d3   :  { %v2724_v29 = vpop.eup %2723 }
 0x9d4   :  { %v940_v30 = vmul.f32 %v939_v24, %v934_v28  ;;  %v935_v31 = vmul.f32 %v2724_v29, %v919_v5 }
 0x9d6   :  { %v941_v36 = vmul.f32 %v939_v24, %v935_v31  ;;  %v3135_v38 = vadd.f32 %v945_v33, %v940_v30 }
 0x9d8   :  { %v3137_v39 = vadd.f32 %v945_v33, %v941_v36 }
 0x9da   :  { %v948_v40 = vpack.c.bf16 %v3137_v39, %v3135_v38 }
 0x9dc   :  { %2482 = vmatmul.mubr.msk.bf16.vlgmr.msra.gmra.mrb[12].mxu0 %vm203_vm4, %v948_v40 }
 0x9dd   :  { %2509 = vmatprep.mubr.msk.bf16.mxu0 %vm2793_vm5, %v2792_v0 }
 0xaaf   :  { %v1002_v51 = vpop.f32.mrb[12].mxu0 }
 0xab0   :  { %v1003_v52 = vadd.f32 %v1002_v51, %v952_v50  ;;  %v2483_v53 = vpop.f32.mrb[13].mxu0 }
 0xab1   :  { %v1005_v54 = vpop.f32.mrb[14].mxu0 }
 0xab2   :  { %v1009_v55 = vmul.f32 %v1003_v52, %v1003_v52  ;;  %v1006_v56 = vadd.f32 %v1005_v54, %v952_v50  ;;  %v2484_v58 = vpop.f32.mrb[15].mxu0 }
 0xab3   :  { %v1157_v58 = vsub.s32 7, %v2892_v6 }
 0xab4   :  { %v1011_v59 = vmul.f32 %v1009_v55, %v1003_v52  ;;  %v1010_v60 = vmul.f32 %v1006_v56, %v1006_v56  ;;  %v1151_v55 = vsub.s32 6, %v2892_v6  ;;  %v2699_v6 = vld [vmem:[%s3446_s13] sm:$0xff]  }
 0xab6   :  { %v1013_v61 = vmul.f32 0.044715, %v1011_v59  ;;  %v1012_v62 = vmul.f32 %v1010_v60, %v1006_v56 }
 0xab8   :  { %v1015_v63 = vadd.f32 %v1013_v61, %v1003_v52  ;;  %v1014_v1 = vmul.f32 0.044715, %v1012_v62 }
 0xaba   :  { %v1017_v35 = vmul.f32 0.7978846, %v1015_v63  ;;  %v1016_v37 = vadd.f32 %v1014_v1, %v1006_v56  ;;  %v1158_v1 = vrot.slane %v2994_v23, %v1157_v58 }
 0xabc   :  { %2725 = vtanh.f32 %v1017_v35  ;;  %v1018_v2 = vmul.f32 0.7978846, %v1016_v37 }
 0xabe   :  { %2727 = vtanh.f32 %v1018_v2 }
 0xac6   :  { %v2726_v32 = vpop.eup %2725 }
 0xac7   :  { %v1021_v4 = vadd.f32 1.0, %v2726_v32 }
 0xac8   :  { %v2728_v5 = vpop.eup %2727 }
 0xac9   :  { %v1023_v7 = vmul.f32 0.5, %v1021_v4  ;;  %v1022_v8 = vadd.f32 1.0, %v2728_v5  ;;  %v3220_v4 = vld [vmem:[%s3444_s11 + $0x8] sm:$0xff] }
 0xacb   :  { %v1024_v9 = vmul.f32 0.5, %v1022_v8  ;;  %v1025_v20 = vmul.f32 %v1023_v7, %v1003_v52 }
 0xacd   :  { %v1026_v21 = vmul.f32 %v1024_v9, %v1006_v56  ;;  %v1152_v56 = vrot.slane %v2994_v23, %v1151_v55  ;;  %v1199_v23 = vrot.slane %v3220_v4, %v2904_v11 }
 0xacf   :  { %v1027_v10 = vpack.c.bf16 %v1026_v21, %v1025_v20 }
 0xad1   :  { %2502 = vmatmul.mubr.bf16.vlgmr.msra.gmra.mrb[32].mxu1 %v1027_v10 }
 0xad2   :  { %2533 = vmatprep.mubr.msk.bf16.mxu1 %vm2793_vm5, %v2792_v0 }
 0xba4   :  { %v1114_v16 = vpop.f32.mrb[32].mxu1 }
 0xba5   :  { %v1115_v17 = vadd.f32 %v1114_v16, %v1031_v15  ;;  %v2503_v18 = vpop.f32.mrb[33].mxu1 }
 0xba6   :  { %v1117_v19 = vpop.f32.mrb[34].mxu1 }
 0xba7   :  { %v1118_v24 = vadd.f32 %v1117_v19, %v1031_v15  ;;  %v2504_v27 = vpop.f32.mrb[35].mxu1  ;;  %v1121_v28 = vadd.f32 %v1115_v17, %v3135_v38 }
 0xba9   :  { %v1123_v29 = vsel %vm203_vm4, %v1121_v28, 0.0  ;;  %v1122_v30 = vadd.f32 %v1118_v24, %v3137_v39  ;;  %v2683_v39 = vld [vmem:[%s3440_s7 + $0x10] sm:$0xff]  }
 0xbaa   :  { %1124 = vadd.xlane.f32.xlu0 %v1123_v29  ;;  %2506 = vmatpush3.bf16.msra.mxu0 %v2683_v39 }
 0xbab   :  { %v1126_v31 = vsel %vm203_vm4, %v1122_v30, 0.0  ;;  %2507 = vmatprep.subr.bf16.mxu0 %v2792_v0 }
 0xbac   :  { %1127 = vadd.xlane.f32.xlu1 %v1126_v31 }
 0xbae   :  { %2508 = vmatpush3.bf16.msra.mxu0 %v2684_v47 }
 0xbaf   :  { %2513 = vmatprep.subr.bf16.mxu0 %v2792_v0 }
 0xc37   :  { %v1125_v33 = vpop.xlane.xlu0 %1124 }
 0xc38   :  { %v1129_v36 = vmul.f32 0.03125, %v1125_v33 }
 0xc39   :  { %v1128_v40 = vpop.xlane.xlu1 %1127 }
 0xc3a   :  { %v1131_v41 = vsub.f32 %v1121_v28, %v1129_v36  ;;  %v1130_v42 = vmul.f32 0.03125, %v1128_v40 }
 0xc3c   :  { %v1132_v43 = vsub.f32 %v1122_v30, %v1130_v42  ;;  %v1133_v44 = vmul.f32 %v1131_v41, %v1131_v41 }
 0xc3e   :  { %v1135_v45 = vsel %vm203_vm4, %v1133_v44, 0.0  ;;  %v1134_v46 = vmul.f32 %v1132_v43, %v1132_v43 }
 0xc3f   :  { %1136 = vadd.xlane.f32.xlu0 %v1135_v45 }
 0xc40   :  { %v1138_v38 = vsel %vm203_vm4, %v1134_v46, 0.0 }
 0xc41   :  { %1139 = vadd.xlane.f32.xlu1 %v1138_v38 }
 0xccc   :  { %v1137_v48 = vpop.xlane.xlu0 %1136 }
 0xccd   :  { %v1141_v50 = vmul.f32 0.03125, %v1137_v48 }
 0xcce   :  { %v1140_v51 = vpop.xlane.xlu1 %1139 }
 0xccf   :  { %v1143_v52 = vadd.f32 1e-12, %v1141_v50  ;;  %v1142_v53 = vmul.f32 0.03125, %v1140_v51 }
 0xcd1   :  { %2729 = vrsqrt.f32 %v1143_v52  ;;  %v1144_v54 = vadd.f32 1e-12, %v1142_v53 }
 0xcd3   :  { %2731 = vrsqrt.f32 %v1144_v54 }
 0xcdb   :  { %v2730_v59 = vpop.eup %2729 }
 0xcdc   :  { %v1147_v60 = vmul.f32 %v2730_v59, %v1131_v41 }
 0xcdd   :  { %v2732_v61 = vpop.eup %2731 }
 0xcde   :  { %v1153_v62 = vmul.f32 %v1152_v56, %v1147_v60  ;;  %v1148_v63 = vmul.f32 %v2732_v61, %v1132_v43 }
 0xce0   :  { %v1154_v35 = vmul.f32 %v1152_v56, %v1148_v63  ;;  %v3208_v37 = vadd.f32 %v1158_v1, %v1153_v62 }
 0xce2   :  { %v3210_v2 = vadd.f32 %v1158_v1, %v1154_v35 }
 0xce4   :  { %v1195_v32 = vpack.c.bf16 %v3210_v2, %v3208_v37 }
 0xce6   :  { %2510 = vmatmul.mubr.msk.bf16.vlgmr.msra.gmra.mrb[16].mxu0 %vm203_vm4, %v1195_v32 }
 0xce7   :  { %2515 = vmatprep.mubr.msk.bf16.mxu0 %vm2793_vm5, %v2792_v0 }
 0xdb9   :  { %v1249_v5 = vpop.f32.mrb[16].mxu0 }
 0xdba   :  { %v1250_v7 = vadd.f32 %v1249_v5, %v1199_v23  ;;  %v2511_v8 = vpop.f32.mrb[17].mxu0 }
 0xdbb   :  { %v1252_v9 = vpop.f32.mrb[18].mxu0 }
 0xdbc   :  { %v1264_v20 = vpack.c.bf16 %v1250_v7, %v1250_v7  ;;  %v1253_v21 = vadd.f32 %v1252_v9, %v1199_v23  ;;  %v2512_v10 = vpop.f32.mrb[19].mxu0 }
 0xdbe   :  { %v2659_v15 = vpack.i.bf16 %v1253_v21, %v1250_v7  ;;  %1269 = vrot.lane.b32.xlu1 %v1264_v20, %s2795_s16  ;;  %v3225_v16 = vpack.c.bf16 %v1253_v21, %v1253_v21 }
 0xdc0   :  { %2660 = vrot.lane.b32.xlu0 %v2659_v15, %s2794_s30 }
 0xdc2   :  { %1318 = vrot.lane.b32.xlu1 %v3225_v16, %s2795_s16 }
 0xe30   :  { %v1270_v17 = vpop.permute.xlu1 %1269 }
 0xe31   :  { %v1275_v18 = vsel %vm401_vm6, %v1270_v17, 0 }
 0xe32   :  { %2514 = vmatpush3.bf16.xpose.msra.mxu0 %v1275_v18  ;;  %v2661_v19 = vpop.permute.xlu0 %2660 }
 0xe33   :  { %v2663_v24 = vunpack.i.h.bf16 %v2661_v19  ;;  %v2662_v27 = vunpack.i.l.bf16 %v2661_v19  ;;  %2519 = vmatprep.subr.bf16.mxu0 %v2792_v0 }
 0xe34   :  { %v1319_v30 = vpop.permute.xlu1 %1318 }
 0xe35   :  { %v3232_v28 = vpack.c.bf16 %v2663_v24, %v2663_v24  ;;  %v3234_v29 = vpack.c.bf16 %v2662_v27, %v2662_v27  ;;  %v1324_v31 = vsel %vm401_vm6, %v1319_v30, 0 }
 0xe37   :  { %1367 = vrot.lane.b32.xlu0 %v3234_v29, %s2795_s16  ;;  %1416 = vrot.lane.b32.xlu1 %v3232_v28, %s2795_s16 }
 0xe39   :  { %2516 = vmatmul.mubr.msk.bf16.vlgmr.msra.gmra.mrb[20].mxu0 %vm401_vm6, %v1264_v20 }
 0xe3a   :  { %2520 = vmatpush3.bf16.xpose.msra.mxu0 %v1324_v31  ;;  %2521 = vmatprep.mubr.msk.bf16.mxu0 %vm2793_vm5, %v2792_v0 }
 0xe3b   :  { %2525 = vmatprep.subr.bf16.mxu0 %v2792_v0 }
 0xe41   :  { %2522 = vmatmul.mubr.msk.bf16.vlgmr.msra.gmra.mrb[24].mxu0 %vm401_vm6, %v3225_v16 }
 0xe42   :  { %2527 = vmatprep.mubr.msk.bf16.mxu0 %vm2793_vm5, %v2792_v0 }
 0xea9   :  { %v1368_v33 = vpop.permute.xlu0 %1367  ;;  %v1417_v36 = vpop.permute.xlu1 %1416 }
 0xeaa   :  { %v1373_v40 = vsel %vm401_vm6, %v1368_v33, 0  ;;  %v1422_v41 = vsel %vm401_vm6, %v1417_v36, 0 }
 0xeab   :  { %2526 = vmatpush3.bf16.xpose.msra.mxu0 %v1373_v40  ;;  %2532 = vmatpush3.bf16.xpose.msra.mxu1 %v1422_v41 }
 0xeac   :  { %2537 = vmatprep.subr.bf16.mxu0 %v2792_v0  ;;  %2543 = vmatprep.subr.bf16.mxu1 %v2792_v0 }
 0xeb2   :  { %2528 = vmatmul.mubr.msk.bf16.vlgmr.msra.gmra.mrb[28].mxu0 %vm401_vm6, %v3234_v29  ;;  %2534 = vmatmul.mubr.msk.bf16.vlgmr.msra.gmra.mrb[36].mxu1 %vm401_vm6, %v3232_v28 }
 0xeb3   :  { %2539 = vmatprep.mubr.msk.bf16.mxu0 %vm2793_vm5, %v2792_v0  ;;  %2545 = vmatprep.mubr.msk.bf16.mxu1 %vm2793_vm5, %v2792_v0 }
 0xf0c   :  { %v1311_v42 = vpop.f32.mrb[20].mxu0 }
 0xf0d   :  { %v1312_v43 = vadd.f32 %v1311_v42, %v3046_v57  ;;  %v2517_v44 = vpop.f32.mrb[21].mxu0 }
 0xf0e   :  { %v1314_v45 = vpop.f32.mrb[22].mxu0 }
 0xf0f   :  { %v2518_v46 = vpop.f32.mrb[23].mxu0  ;;  %v1464_v38 = vsel %vm595_vm8, %v1312_v43, -inf }
 0xf10   :  { %1465 = vmax.xlane.f32.xlu0 %v1464_v38 }
 0xf14   :  { %v1360_v39 = vpop.f32.mrb[24].mxu0 }
 0xf15   :  { %v1361_v47 = vadd.f32 %v1360_v39, %v3051_v3  ;;  %v2523_v48 = vpop.f32.mrb[25].mxu0 }
 0xf16   :  { %v1363_v50 = vpop.f32.mrb[26].mxu0 }
 0xf17   :  { %v2524_v51 = vpop.f32.mrb[27].mxu0  ;;  %v1467_v52 = vsel %vm595_vm8, %v1361_v47, -inf }
 0xf18   :  { %1468 = vmax.xlane.f32.xlu1 %v1467_v52 }
 0xf29   :  { %1512 = vrot.lane.b32.xlu1 %v1264_v20, %s2797_s2 }
 0xf85   :  { %v1409_v53 = vpop.f32.mrb[28].mxu0  ;;  %v1458_v54 = vpop.f32.mrb[36].mxu1 }
 0xf86   :  { %v1410_v57 = vadd.f32 %v1409_v53, %v3058_v14  ;;  %v2529_v56 = vpop.f32.mrb[29].mxu0  ;;  %v2535_v59 = vpop.f32.mrb[37].mxu1  ;;  %v1459_v62 = vadd.f32 %v1458_v54, %v3063_v25 }
 0xf87   :  { %v1412_v60 = vpop.f32.mrb[30].mxu0  ;;  %v1461_v61 = vpop.f32.mrb[38].mxu1 }
 0xf88   :  { %v2530_v63 = vpop.f32.mrb[31].mxu0  ;;  %v2536_v3 = vpop.f32.mrb[39].mxu1  ;;  %v1470_v1 = vsel %vm595_vm8, %v1410_v57, -inf  ;;  %v1473_v35 = vsel %vm595_vm8, %v1459_v62, -inf }
 0xf89   :  { %1471 = vmax.xlane.f32.xlu0 %v1470_v1  ;;  %v2685_v63 = vld [vmem:[%s3441_s8 + $0x10] sm:$0xff]  }
 0xf8d   :  { %1474 = vmax.xlane.f32.xlu0 %v1473_v35  ;;  %v2686_v35 = vld [vmem:[%s3441_s8 + $0x18] sm:$0xff]  }
 0xf9d   :  { %v1466_v32 = vpop.xlane.xlu0 %1465 }
 0xf9e   :  { %v1476_v23 = vsub.f32 %v1312_v43, %v1466_v32 }
 0xfa0   :  { %v1480_v5 = vmul.f32 1.442695, %v1476_v23 }
 0xfa2   :  { %2733 = vpow2.f32 %v1480_v5 }
 0xfa5   :  { %v1469_v7 = vpop.xlane.xlu1 %1468 }
 0xfa6   :  { %v1477_v14 = vsub.f32 %v1361_v47, %v1469_v7 }
 0xfa8   :  { %v1482_v8 = vmul.f32 1.442695, %v1477_v14 }
 0xfa9   :  { %v1513_v9 = vpop.permute.xlu1 %1512 }
 0xfaa   :  { %2735 = vpow2.f32 %v1482_v8  ;;  %v1518_v20 = vsel %vm649_vm9, %v1513_v9, 0 }
 0xfab   :  { %2538 = vmatpush3.bf16.msra.mxu0 %v1518_v20 }
 0xfac   :  { %v2734_v25 = vpop.eup %2733  ;;  %2549 = vmatprep.subr.bf16.mxu0 %v2792_v0 }
 0xfad   :  { %v1488_v21 = vsel %vm595_vm8, %v2734_v25, 0.0 }
 0xfae   :  { %1489 = vadd.xlane.f32.xlu1 %v1488_v21 }
 0xfb4   :  { %v2736_v10 = vpop.eup %2735 }
 0xfb5   :  { %v1491_v15 = vsel %vm595_vm8, %v2736_v10, 0.0 }
 0xfb6   :  { %1492 = vadd.xlane.f32.xlu0 %v1491_v15 }
0x1016   :  { %v1472_v17 = vpop.xlane.xlu0 %1471 }
0x1017   :  { %v1478_v18 = vsub.f32 %v1410_v57, %v1472_v17 }
0x1019   :  { %v1484_v19 = vmul.f32 1.442695, %v1478_v18 }
0x101a   :  { %v1475_v24 = vpop.xlane.xlu0 %1474 }
0x101b   :  { %2737 = vpow2.f32 %v1484_v19  ;;  %v1479_v27 = vsub.f32 %v1459_v62, %v1475_v24 }
0x101d   :  { %v1486_v30 = vmul.f32 1.442695, %v1479_v27 }
0x101f   :  { %2739 = vpow2.f32 %v1486_v30 }
0x1025   :  { %v2738_v31 = vpop.eup %2737 }
0x1026   :  { %v1494_v33 = vsel %vm595_vm8, %v2738_v31, 0.0 }
0x1027   :  { %1495 = vadd.xlane.f32.xlu1 %v1494_v33  ;;  %v1718_v33 = vrot.slane %v3220_v4, %v2907_v12 }
0x1029   :  { %v2740_v36 = vpop.eup %2739 }
0x102a   :  { %v1497_v40 = vsel %vm595_vm8, %v2740_v36, 0.0 }
0x102b   :  { %1498 = vadd.xlane.f32.xlu0 %v1497_v40 }
0x1038   :  { %1608 = vrot.lane.b32.xlu1 %v3234_v29, %s2797_s2 }
0x103b   :  { %v1490_v41 = vpop.xlane.xlu1 %1489 }
0x103c   :  { %2741 = vrcp.f32 %v1490_v41  ;;  %1656 = vrot.lane.b32.xlu1 %v3232_v28, %s2797_s2 }
0x1041   :  { %1560 = vrot.lane.b32.xlu0 %v3225_v16, %s2797_s2 }
0x1043   :  { %v1493_v45 = vpop.xlane.xlu0 %1492 }
0x1044   :  { %2743 = vrcp.f32 %v1493_v45 }
0x1046   :  { %v2742_v42 = vpop.eup %2741 }
0x1047   :  { %v1504_v43 = vmul.f32 %v2742_v42, %v2734_v25 }
0x1049   :  { %v1508_v44 = vpack.c.bf16 %v1504_v43, %v1504_v43 }
0x104b   :  { %2540 = vmatmul.mubr.msk.bf16.vlgmr.msra.gmra.mrb[32].mxu0 %vm595_vm8, %v1508_v44 }
0x104c   :  { %2551 = vmatprep.mubr.msk.bf16.mxu0 %vm2793_vm5, %v2792_v0 }
0x104e   :  { %v2744_v29 = vpop.eup %2743 }
0x104f   :  { %v1505_v16 = vmul.f32 %v2744_v29, %v2736_v10 }
0x1051   :  { %v1509_v52 = vpack.c.bf16 %v1505_v16, %v1505_v16 }
0x10b4   :  { %v1496_v46 = vpop.xlane.xlu1 %1495 }
0x10b5   :  { %2745 = vrcp.f32 %v1496_v46 }
0x10b8   :  { %v1609_v38 = vpop.permute.xlu1 %1608  ;;  %v1499_v39 = vpop.xlane.xlu0 %1498 }
0x10b9   :  { %v1614_v28 = vsel %vm649_vm9, %v1609_v38, 0  ;;  %2747 = vrcp.f32 %v1499_v39 }
0x10ba   :  { %2550 = vmatpush3.bf16.msra.mxu0 %v1614_v28 }
0x10bb   :  { %2561 = vmatprep.subr.bf16.mxu0 %v2792_v0 }
0x10bc   :  { %v1561_v47 = vpop.permute.xlu0 %1560  ;;  %v1657_v50 = vpop.permute.xlu1 %1656 }
0x10bd   :  { %v1566_v48 = vsel %vm649_vm9, %v1561_v47, 0  ;;  %v1662_v54 = vsel %vm649_vm9, %v1657_v50, 0 }
0x10be   :  { %2544 = vmatpush3.bf16.msra.mxu1 %v1566_v48 }
0x10bf   :  { %v2746_v51 = vpop.eup %2745  ;;  %2555 = vmatprep.subr.bf16.mxu1 %v2792_v0 }
0x10c0   :  { %v1506_v53 = vmul.f32 %v2746_v51, %v2738_v31 }
0x10c1   :  { %2546 = vmatmul.mubr.msk.bf16.vlgmr.msra.gmra.mrb[40].mxu1 %vm595_vm8, %v1509_v52 }
0x10c2   :  { %2556 = vmatpush3.bf16.msra.mxu1 %v1662_v54  ;;  %v1510_v57 = vpack.c.bf16 %v1506_v53, %v1506_v53  ;;  %2557 = vmatprep.mubr.msk.bf16.mxu1 %vm2793_vm5, %v2792_v0  ;;  %v2688_v54 = vld [vmem:[%s3442_s9 + $0x18] sm:$0xff]  }
0x10c3   :  { %v2748_v56 = vpop.eup %2747  ;;  %2569 = vmatprep.subr.bf16.mxu1 %v2792_v0 }
0x10c4   :  { %v1507_v59 = vmul.f32 %v2748_v56, %v2740_v36  ;;  %2552 = vmatmul.mubr.msk.bf16.vlgmr.msra.gmra.mrb[36].mxu0 %vm595_vm8, %v1510_v57 }
0x10c5   :  { %2565 = vmatprep.mubr.msk.bf16.mxu0 %vm2793_vm5, %v2792_v0  ;;  %2562 = vmatpush3.bf16.msra.mxu0 %v2685_v63  ;;  %v1806_v63 = vrot.slane %v3220_v4, %v938_v22  ;;  %v2689_v22 = vld [vmem:[%s3443_s10 + $0x40] sm:$0xff]  }
0x10c6   :  { %v1511_v60 = vpack.c.bf16 %v1507_v59, %v1507_v59  ;;  %2563 = vmatprep.subr.bf16.mxu0 %v2792_v0 }
0x10c9   :  { %2558 = vmatmul.mubr.msk.bf16.vlgmr.msra.gmra.mrb[44].mxu1 %vm595_vm8, %v1511_v60  ;;  %2564 = vmatpush3.bf16.msra.mxu0 %v2686_v35 }
0x10ca   :  { %2573 = vmatprep.mubr.msk.bf16.mxu1 %vm2793_vm5, %v2792_v0  ;;  %2577 = vmatprep.subr.bf16.mxu0 %v2792_v0 }
0x111e   :  { %v1554_v61 = vpop.f32.mrb[32].mxu0 }
0x111f   :  { %v2541_v62 = vpop.f32.mrb[33].mxu0 }
0x1120   :  { %v1557_v3 = vpop.f32.mrb[34].mxu0 }
0x1121   :  { %v2542_v1 = vpop.f32.mrb[35].mxu0 }
0x1194   :  { %v1602_v32 = vpop.f32.mrb[40].mxu1 }
0x1195   :  { %v2547_v23 = vpop.f32.mrb[41].mxu1 }
0x1196   :  { %v1605_v5 = vpop.f32.mrb[42].mxu1 }
0x1197   :  { %v2548_v7 = vpop.f32.mrb[43].mxu1  ;;  %v1650_v14 = vpop.f32.mrb[36].mxu0  ;;  %v1812_v5 = vrot.slane %v3220_v4, %v944_v26  ;;  %v2690_v26 = vld [vmem:[%s3443_s10 + $0x48] sm:$0xff]  }
0x1198   :  { %v2553_v8 = vpop.f32.mrb[37].mxu0 }
0x1199   :  { %v1653_v9 = vpop.f32.mrb[38].mxu0 }
0x119a   :  { %v2554_v20 = vpop.f32.mrb[39].mxu0 }
0x119b   :  { %v2691_v20 = vld [vmem:[%s3443_s10 + $0x50] sm:$0xff]  }
0x119c   :  { %v1698_v25 = vpop.f32.mrb[44].mxu1 }
0x119d   :  { %v2664_v21 = vpack.i.bf16 %v1698_v25, %v1650_v14  ;;  %v2559_v10 = vpop.f32.mrb[45].mxu1  ;;  %v2692_v25 = vld [vmem:[%s3443_s10 + $0x58] sm:$0xff]  }
0x119e   :  { %v1701_v15 = vpop.f32.mrb[46].mxu1  ;;  %v2694_v10 = vld [vmem:[%s3443_s10 + $0x68] sm:$0xff]  }
0x119f   :  { %2665 = vrot.lane.b32.xlu0 %v2664_v21, %s2798_s21  ;;  %v2560_v17 = vpop.f32.mrb[47].mxu1  ;;  %v2693_v21 = vld [vmem:[%s3443_s10 + $0x60] sm:$0xff]   ;;  %v2695_v15 = vld [vmem:[%s3443_s10 + $0x70] sm:$0xff]  }
0x11a0   :  { %v2696_v17 = vld [vmem:[%s3443_s10 + $0x78] sm:$0xff]  }
0x1211   :  { %v2666_v18 = vpop.permute.xlu0 %2665 }
0x1212   :  { %v2668_v19 = vunpack.i.h.bf16 %v2666_v18  ;;  %v2667_v24 = vunpack.i.l.bf16 %v2666_v18  ;;  %v1819_v18 = vrot.slane %v3220_v4, %v951_v49 }
0x1214   :  { %v1713_v27 = vsel %vm401_vm6, %v1602_v32, %v2668_v19  ;;  %v1712_v30 = vsel %vm401_vm6, %v1554_v61, %v2667_v24 }
0x1215   :  { %v1714_v31 = vpack.c.bf16 %v1713_v27, %v1712_v30 }
0x1217   :  { %2566 = vmatmul.mubr.msk.bf16.vlgmr.msra.gmra.mrb[40].mxu0 %vm203_vm4, %v1714_v31 }
0x1218   :  { %2593 = vmatprep.mubr.msk.bf16.mxu0 %vm2793_vm5, %v2792_v0  ;;  %2578 = vmatpush3.bf16.msra.mxu0 %v2689_v22  ;;  %v2698_v22 = vld [vmem:[%s3445_s12 + $0x8] sm:$0xff]  }
0x1219   :  { %2579 = vmatprep.subr.bf16.mxu0 %v2792_v0 }
0x121c   :  { %2580 = vmatpush3.bf16.msra.mxu0 %v2690_v26 }
0x121d   :  { %2581 = vmatprep.subr.bf16.mxu0 %v2792_v0 }
0x1220   :  { %2582 = vmatpush3.bf16.msra.mxu0 %v2691_v20 }
0x1221   :  { %2583 = vmatprep.subr.bf16.mxu0 %v2792_v0 }
0x1224   :  { %2584 = vmatpush3.bf16.msra.mxu0 %v2692_v25 }
0x1225   :  { %2585 = vmatprep.subr.bf16.mxu0 %v2792_v0 }
0x1228   :  { %2586 = vmatpush3.bf16.msra.mxu0 %v2693_v21 }
0x1229   :  { %2587 = vmatprep.subr.bf16.mxu0 %v2792_v0 }
0x122c   :  { %2588 = vmatpush3.bf16.msra.mxu0 %v2694_v10 }
0x122d   :  { %2589 = vmatprep.subr.bf16.mxu0 %v2792_v0 }
0x1230   :  { %2590 = vmatpush3.bf16.msra.mxu0 %v2695_v15 }
0x1231   :  { %2591 = vmatprep.subr.bf16.mxu0 %v2792_v0 }
0x1234   :  { %2592 = vmatpush3.bf16.msra.mxu0 %v2696_v17  ;;  %v2019_v17 = vrot.slane %v3220_v4, %v1151_v55 }
0x12ea   :  { %v1768_v36 = vpop.f32.mrb[40].mxu0 }
0x12eb   :  { %v1769_v40 = vadd.f32 %v1768_v36, %v1718_v33  ;;  %v2567_v41 = vpop.f32.mrb[41].mxu0 }
0x12ec   :  { %v1771_v42 = vpop.f32.mrb[42].mxu0 }
0x12ed   :  { %v1772_v43 = vadd.f32 %v1771_v42, %v1718_v33  ;;  %v2568_v44 = vpop.f32.mrb[43].mxu0  ;;  %v1775_v45 = vadd.f32 %v1769_v40, %v3208_v37 }
0x12ef   :  { %v1777_v46 = vsel %vm203_vm4, %v1775_v45, 0.0  ;;  %v1776_v29 = vadd.f32 %v1772_v43, %v3210_v2  ;;  %v2687_v2 = vld [vmem:[%s3442_s9 + $0x10] sm:$0xff]  }
0x12f0   :  { %1778 = vadd.xlane.f32.xlu1 %v1777_v46  ;;  %2570 = vmatpush3.bf16.msra.mxu1 %v2687_v2 }
0x12f1   :  { %v1780_v38 = vsel %vm203_vm4, %v1776_v29, 0.0  ;;  %2571 = vmatprep.subr.bf16.mxu1 %v2792_v0 }
0x12f2   :  { %1781 = vadd.xlane.f32.xlu0 %v1780_v38 }
0x12f4   :  { %2572 = vmatpush3.bf16.msra.mxu1 %v2688_v54 }
0x12f5   :  { %2597 = vmatprep.subr.bf16.mxu1 %v2792_v0 }
0x137d   :  { %v1779_v39 = vpop.xlane.xlu1 %1778 }
0x137e   :  { %v1783_v28 = vmul.f32 0.03125, %v1779_v39 }
0x137f   :  { %v1782_v16 = vpop.xlane.xlu0 %1781 }
0x1380   :  { %v1785_v47 = vsub.f32 %v1775_v45, %v1783_v28  ;;  %v1784_v48 = vmul.f32 0.03125, %v1782_v16 }
0x1382   :  { %v1786_v50 = vsub.f32 %v1776_v29, %v1784_v48  ;;  %v1787_v51 = vmul.f32 %v1785_v47, %v1785_v47 }
0x1384   :  { %v1789_v52 = vsel %vm203_vm4, %v1787_v51, 0.0  ;;  %v1788_v53 = vmul.f32 %v1786_v50, %v1786_v50 }
0x1385   :  { %1790 = vadd.xlane.f32.xlu0 %v1789_v52 }
0x1386   :  { %v1792_v37 = vsel %vm203_vm4, %v1788_v53, 0.0  ;;  %v1898_v53 = vrot.slane %v3220_v4, %v1030_v13 }
0x1387   :  { %1793 = vadd.xlane.f32.xlu1 %v1792_v37 }
0x1412   :  { %v1791_v57 = vpop.xlane.xlu0 %1790 }
0x1413   :  { %v1795_v56 = vmul.f32 0.03125, %v1791_v57 }
0x1414   :  { %v1794_v59 = vpop.xlane.xlu1 %1793 }
0x1415   :  { %v1797_v60 = vadd.f32 1e-12, %v1795_v56  ;;  %v1796_v61 = vmul.f32 0.03125, %v1794_v59 }
0x1417   :  { %2749 = vrsqrt.f32 %v1797_v60  ;;  %v1798_v62 = vadd.f32 1e-12, %v1796_v61 }
0x1419   :  { %2751 = vrsqrt.f32 %v1798_v62 }
0x1421   :  { %v2750_v3 = vpop.eup %2749 }
0x1422   :  { %v1801_v1 = vmul.f32 %v2750_v3, %v1785_v47 }
0x1423   :  { %v2752_v35 = vpop.eup %2751 }
0x1424   :  { %v1807_v32 = vmul.f32 %v1806_v63, %v1801_v1  ;;  %v1802_v23 = vmul.f32 %v2752_v35, %v1786_v50 }
0x1426   :  { %v1808_v7 = vmul.f32 %v1806_v63, %v1802_v23  ;;  %v3336_v14 = vadd.f32 %v1812_v5, %v1807_v32 }
0x1428   :  { %v3338_v8 = vadd.f32 %v1812_v5, %v1808_v7 }
0x142a   :  { %v1815_v9 = vpack.c.bf16 %v3338_v8, %v3336_v14 }
0x142c   :  { %2574 = vmatmul.mubr.msk.bf16.vlgmr.msra.gmra.mrb[48].mxu1 %vm203_vm4, %v1815_v9 }
0x142d   :  { %2601 = vmatprep.mubr.msk.bf16.mxu1 %vm2793_vm5, %v2792_v0 }
0x14ff   :  { %v1869_v19 = vpop.f32.mrb[48].mxu1 }
0x1500   :  { %v1870_v24 = vadd.f32 %v1869_v19, %v1819_v18  ;;  %v2575_v27 = vpop.f32.mrb[49].mxu1  ;;  %v2025_v19 = vrot.slane %v3220_v4, %v1157_v58  ;;  %v2700_v58 = vld [vmem:[%s3446_s13 + $0x8] sm:$0xff]   ;;  %v2028_v4 = vld [vmem:[%s3447_s14] sm:$0x3]  ;;  %s2799_s13 = smov [#allocation2]  }
0x1501   :  { %v1872_v30 = vpop.f32.mrb[50].mxu1  ;;  %s2187_s14 = sshll.u32 %s2799_s13, 4  ;;  %s2188_s14 = int_to_ptr.vmem [resolvable:$true] %s2187_s14 }
0x1502   :  { %v1876_v31 = vmul.f32 %v1870_v24, %v1870_v24  ;;  %v1873_v33 = vadd.f32 %v1872_v30, %v1819_v18  ;;  %v2576_v36 = vpop.f32.mrb[51].mxu1  ;;  %s2767_s26 = scalar_lea.vmem %s2188_s14, 32  ;;  %p2772_p1 = scmp.lt.s32.totalorder %s2188_s14, %s2188_s14 }
0x1503   :  { %p2768_p0 = scmp.ne.s32.totalorder %s2188_s14, %s2767_s26  ;;  %p2773_p2 = scmp.lt.s32.totalorder %s2767_s26, %s2767_s26 }
0x1504   :  { %v1878_v40 = vmul.f32 %v1876_v31, %v1870_v24  ;;  %v1877_v41 = vmul.f32 %v1873_v33, %v1873_v33 }
0x1505   :  { %p2774_p3 = por %p2773_p2, %p2772_p1 }
0x1506   :  { %v1880_v42 = vmul.f32 0.044715, %v1878_v40  ;;  %v1879_v43 = vmul.f32 %v1877_v41, %v1873_v33 }
0x1507   :  { %p2775_p4 = pnand %p2774_p3, %p2768_p0 }
0x1508   :  { %v1882_v44 = vadd.f32 %v1880_v42, %v1870_v24  ;;  %v1881_v45 = vmul.f32 0.044715, %v1879_v43 }
0x150a   :  { %v1884_v46 = vmul.f32 0.7978846, %v1882_v44  ;;  %v1883_v29 = vadd.f32 %v1881_v45, %v1873_v33 }
0x150c   :  { %2753 = vtanh.f32 %v1884_v46  ;;  %v1885_v38 = vmul.f32 0.7978846, %v1883_v29  ;;  %v2038_v29 = vrot.slane %v2028_v4, %v2904_v11 }
0x150e   :  { %2755 = vtanh.f32 %v1885_v38 }
0x1516   :  { %v2754_v39 = vpop.eup %2753 }
0x1517   :  { %v1888_v49 = vadd.f32 1.0, %v2754_v39 }
0x1518   :  { %v2756_v28 = vpop.eup %2755 }
0x1519   :  { %v1890_v16 = vmul.f32 0.5, %v1888_v49  ;;  %v1889_v47 = vadd.f32 1.0, %v2756_v28 }
0x151b   :  { %v1891_v48 = vmul.f32 0.5, %v1889_v47  ;;  %v1892_v50 = vmul.f32 %v1890_v16, %v1870_v24 }
0x151d   :  { %v1893_v51 = vmul.f32 %v1891_v48, %v1873_v33 }
0x151f   :  { %v1894_v52 = vpack.c.bf16 %v1893_v51, %v1892_v50 }
0x1521   :  { %2594 = vmatmul.mubr.bf16.vlgmr.msra.gmra.mrb[44].mxu0 %v1894_v52 }
0x15f4   :  { %v1981_v37 = vpop.f32.mrb[44].mxu0 }
0x15f5   :  { %v1982_v2 = vadd.f32 %v1981_v37, %v1898_v53  ;;  %v2595_v54 = vpop.f32.mrb[45].mxu0 }
0x15f6   :  { %v1984_v57 = vpop.f32.mrb[46].mxu0 }
0x15f7   :  { %v1985_v56 = vadd.f32 %v1984_v57, %v1898_v53  ;;  %v2596_v59 = vpop.f32.mrb[47].mxu0  ;;  %v1988_v60 = vadd.f32 %v1982_v2, %v3336_v14 }
0x15f9   :  { %v1990_v61 = vsel %vm203_vm4, %v1988_v60, 0.0  ;;  %v1989_v62 = vadd.f32 %v1985_v56, %v3338_v8  ;;  %v2697_v8 = vld [vmem:[%s3445_s12] sm:$0xff]  }
0x15fa   :  { %1991 = vadd.xlane.f32.xlu1 %v1990_v61  ;;  %2598 = vmatpush3.bf16.msra.mxu1 %v2697_v8 }
0x15fb   :  { %v1993_v63 = vsel %vm203_vm4, %v1989_v62, 0.0  ;;  %2599 = vmatprep.subr.bf16.mxu1 %v2792_v0 }
0x15fc   :  { %1994 = vadd.xlane.f32.xlu0 %v1993_v63 }
0x15fe   :  { %2600 = vmatpush3.bf16.msra.mxu1 %v2698_v22 }
0x15ff   :  { %2605 = vmatprep.subr.bf16.mxu1 %v2792_v0 }
0x1687   :  { %v1992_v3 = vpop.xlane.xlu1 %1991 }
0x1688   :  { %v1996_v1 = vmul.f32 0.03125, %v1992_v3 }
0x1689   :  { %v1995_v35 = vpop.xlane.xlu0 %1994 }
0x168a   :  { %v1998_v13 = vsub.f32 %v1988_v60, %v1996_v1  ;;  %v1997_v32 = vmul.f32 0.03125, %v1995_v35 }
0x168c   :  { %v1999_v23 = vsub.f32 %v1989_v62, %v1997_v32  ;;  %v2000_v5 = vmul.f32 %v1998_v13, %v1998_v13 }
0x168e   :  { %v2002_v7 = vsel %vm203_vm4, %v2000_v5, 0.0  ;;  %v2001_v9 = vmul.f32 %v1999_v23, %v1999_v23 }
0x168f   :  { %2003 = vadd.xlane.f32.xlu1 %v2002_v7 }
0x1690   :  { %v2005_v14 = vsel %vm203_vm4, %v2001_v9, 0.0 }
0x1691   :  { %2006 = vadd.xlane.f32.xlu0 %v2005_v14 }
0x171c   :  { %v2004_v26 = vpop.xlane.xlu1 %2003 }
0x171d   :  { %v2008_v20 = vmul.f32 0.03125, %v2004_v26 }
0x171e   :  { %v2007_v25 = vpop.xlane.xlu0 %2006 }
0x171f   :  { %v2010_v21 = vadd.f32 1e-12, %v2008_v20  ;;  %v2009_v10 = vmul.f32 0.03125, %v2007_v25 }
0x1721   :  { %2757 = vrsqrt.f32 %v2010_v21  ;;  %v2011_v15 = vadd.f32 1e-12, %v2009_v10 }
0x1723   :  { %2759 = vrsqrt.f32 %v2011_v15 }
0x172b   :  { %v2758_v18 = vpop.eup %2757 }
0x172c   :  { %v2014_v24 = vmul.f32 %v2758_v18, %v1998_v13 }
0x172d   :  { %v2760_v27 = vpop.eup %2759 }
0x172e   :  { %v2020_v30 = vmul.f32 %v2019_v17, %v2014_v24  ;;  %v2015_v31 = vmul.f32 %v2760_v27, %v1999_v23 }
0x1730   :  { %v2026_v33 = vadd.f32 %v2025_v19, %v2020_v30  ;;  %v2021_v36 = vmul.f32 %v2019_v17, %v2015_v31 }
0x1732   :  { %v2027_v40 = vadd.f32 %v2025_v19, %v2021_v36  ;;  %v2029_v41 = vpack.c.bf16 %v2026_v33, %v2026_v33 }
0x1734   :  { %v2030_v42 = vpack.c.bf16 %v2027_v40, %v2027_v40  ;;  %v2041_v44 = vunpack.c.l.b16 %v2029_v41 }
0x1736   :  { %v2042_v43 = vunpack.c.l.b16 %v2030_v42 }
0x1738   :  { %v2043_v45 = vrot.slane %v2042_v43, 7 }
0x173a   :  { %v2045_v46 = vsel %vm2044_vm10, %v2043_v45, %v2041_v44 }
0x173b   :  { %v2046_v55 = vpack.c.b16 %v2045_v46, %v2045_v46 }
0x173d   :  { %2602 = vmatmul.mubr.msk.bf16.vlgmr.msra.gmra.mrb[52].mxu1 %vm203_vm4, %v2046_v55 }
0x173e   :  { %2609 = vmatprep.mubr.msk.bf16.mxu1 %vm2793_vm5, %v2792_v0  ;;  %2606 = vmatpush3.bf16.msra.mxu1 %v2699_v6 }
0x173f   :  { %2607 = vmatprep.subr.bf16.mxu1 %v2792_v0  ;;  %v2111_v0 = vrot.slane %v2028_v4, %v2907_v12 }
0x1742   :  { %2608 = vmatpush3.bf16.msra.mxu1 %v2700_v58 }
0x1810   :  { %v2096_v38 = vpop.f32.mrb[52].mxu1 }
0x1811   :  { %v2097_v39 = vadd.f32 %v2096_v38, %v2038_v29  ;;  %v2603_v49 = vpop.f32.mrb[53].mxu1 }
0x1812   :  { %v2099_v28 = vpop.f32.mrb[54].mxu1 }
0x1813   :  { %2761 = vtanh.f32 %v2097_v39  ;;  %v2604_v16 = vpop.f32.mrb[55].mxu1 }
0x181d   :  { %v2762_v47 = vpop.eup %2761 }
0x181e   :  { %v2103_v48 = vpack.c.bf16 %v2762_v47, %v2762_v47 }
0x1820   :  { %2610 = vmatmul.mubr.msk.bf16.vlgmr.msra.gmra.mrb[56].mxu1 %vm203_vm4, %v2103_v48 }
0x18f3   :  { %v2161_v50 = vpop.f32.mrb[56].mxu1 }
0x18f4   :  { %v2162_v51 = vadd.f32 %v2161_v50, %v2111_v0  ;;  %v2611_v52 = vpop.f32.mrb[57].mxu1 }
0x18f5   :  { %v2164_v53 = vpop.f32.mrb[58].mxu1 }
0x18f6   :  { %v2612_v37 = vpop.f32.mrb[59].mxu1  ;;  %v2168_v11 = vsel %vm2167_vm11, %v2162_v51, -1e+30 }
0x18f7   :  { %v2169_v2 = vsel %vm249_vm7, %v2168_v11, -inf }
0x18f8   :  { %2170 = vmax.xlane.f32.xlu0 %v2169_v2 }
0x1985   :  { %v2171_v54 = vpop.xlane.xlu0 %2170 }
0x1986   :  { %v2172_v57 = vsub.f32 %v2168_v11, %v2171_v54 }
0x1988   :  { %v2173_v56 = vmul.f32 1.442695, %v2172_v57 }
0x198a   :  { %2763 = vpow2.f32 %v2173_v56 }
0x1994   :  { %v2764_v59 = vpop.eup %2763 }
0x1995   :  { %v2175_v60 = vsel %vm249_vm7, %v2764_v59, 0.0 }
0x1996   :  { %2176 = vadd.xlane.f32.xlu1 %v2175_v60 }
0x1a23   :  { %v2177_v12 = vpop.xlane.xlu1 %2176 }
0x1a24   :  { %2765 = vrcp.f32 %v2177_v12 }
0x1a2e   :  { %v2766_v34 = vpop.eup %2765 }
0x1a2f   :  { %v2179_v61 = vmul.f32 %v2766_v34, %v2764_v59 }
0x1a31   :  { %2180 = vst [vmem:[#allocation2] sm:$0x3] %v2179_v61 }
0x1a32   :  { %2778 = shalt.err (!%p2775_p4)
}
0x1a33   :  { %s2779_s28 = scalar_lea.hbm %s3448_s15, 32 }
0x1a34   :  { %p2780_p5 = scmp.ne.s32.totalorder %s3448_s15, %s2779_s28  ;;  %p2783_p6 = scmp.lt.u32.totalorder %s2779_s28, %s3448_s15 }
0x1a36   :  { %p2785_p7 = pnand %p2783_p6, %p2780_p5 }
0x1a38   :  { %2788 = shalt.err (!%p2785_p7)
}
0x1a39   :  { %2190 = dma.vmem_to_hbm [thread:$0]  %s2188_s14, 32, %s3448_s15, [#allocation3]  }
0x1a3a   :  { %2789 = dma.done.wait [#allocation3], 32  }
0x1a3b   :  { %2790 = vsyncadd [#allocation3], 4294967264 }
0x1a3c   :  { %2194 = vsyncpa [#allocation3], 1 }

</bundles_post_ra>
